<compile_context>
chip_gen: v5e
topology: v5e:2x2
jax: 0.10.0
libtpu: 0.0.40
codegen_flags: <defaults>
</compile_context>

<pallas_src>
import jax
import jax.numpy as jnp
from jax.experimental import pallas as pl
from jax.experimental.pallas import tpu as pltpu

IN_DIM = 64 * 64      # 4096
H1 = 512
H2 = 256
OUT_DIM = 5
OUT_PAD = 128         # lane-aligned padded output width
TK = 1024             # fc1 contraction chunk (4096 = 4 x 1024)


def _chip_tiling():
    """Chip-gated batch tile + scoped-VMEM limit.
    v7x has 64 MiB VMEM per TensorCore -> TM=512; v5e/v6e have 128 MiB -> TM=1024."""
    try:
        vmem = pltpu.get_tpu_info().vmem_capacity_bytes
    except Exception:
        vmem = 64 << 20
    if vmem <= (64 << 20):
        return 512, 40 << 20
    return 1024, 56 << 20


def mlp_kernel(x_ref, w1_ref, b1_ref, w2_ref, b2_ref, w3_ref, b3_ref, o_ref, acc_ref):
    k = pl.program_id(1)

    @pl.when(k == 0)
    def _():
        acc_ref[...] = jnp.zeros_like(acc_ref)

    # fc1 partial contraction over this K chunk (bf16 MXU, f32 accumulate).
    x_blk = x_ref[...]
    if x_blk.dtype != jnp.bfloat16:       # trace-time branch: no-op for bf16 inputs
        x_blk = x_blk.astype(jnp.bfloat16)
    acc_ref[...] += jnp.dot(x_blk, w1_ref[...], preferred_element_type=jnp.float32)

    @pl.when(k == pl.num_programs(1) - 1)
    def _():
        # fc1 epilogue + fc2 + fc3 run only on the last K chunk.
        h1 = jnp.maximum(acc_ref[...] + b1_ref[...], 0.0)
        h2 = jnp.dot(h1.astype(jnp.bfloat16), w2_ref[...],
                     preferred_element_type=jnp.float32)
        h2 = jnp.maximum(h2 + b2_ref[...], 0.0)
        # Padded lanes of w3/b3 are zero -> exact zeros in the padded logits.
        o_ref[...] = jnp.dot(h2.astype(jnp.bfloat16), w3_ref[...],
                             preferred_element_type=jnp.float32) + b3_ref[...]


def fabric_defect_forward(x_nchw, prepared_params):
    """x_nchw: [B, 1, 64, 64] float32 or bfloat16 -> logits [B, 5] float32."""
    w1, b1, w2, b2, w3p, b3p = prepared_params
    B = x_nchw.shape[0]
    x2d = x_nchw.reshape(B, IN_DIM)       # mirrors x.view(-1, 64*64)

    tm_max, vmem_limit = _chip_tiling()
    tm = B if B <= tm_max else tm_max
    nk = IN_DIM // TK
    grid = (pl.cdiv(B, tm), nk)

    resident = pl.Buffered(1)             # grid-invariant blocks: single-buffer

    flops = 2 * B * (IN_DIM * H1 + H1 * H2 + H2 * OUT_PAD)
    bytes_accessed = int(
        x2d.size * x2d.dtype.itemsize
        + sum(int(a.size) * a.dtype.itemsize for a in (w1, b1, w2, b2, w3p, b3p))
        + B * OUT_PAD * 4)

    out_padded = pl.pallas_call(
        mlp_kernel,
        out_shape=jax.ShapeDtypeStruct((B, OUT_PAD), jnp.float32),
        grid=grid,
        in_specs=[
            pl.BlockSpec((tm, TK), lambda i, k: (i, k)),      # x: batch & K tiled
            pl.BlockSpec((TK, H1), lambda i, k: (k, 0)),      # w1: streamed per K chunk
            pl.BlockSpec((1, H1), lambda i, k: (0, 0), pipeline_mode=resident),
            pl.BlockSpec((H1, H2), lambda i, k: (0, 0), pipeline_mode=resident),
            pl.BlockSpec((1, H2), lambda i, k: (0, 0), pipeline_mode=resident),
            pl.BlockSpec((H2, OUT_PAD), lambda i, k: (0, 0), pipeline_mode=resident),
            pl.BlockSpec((1, OUT_PAD), lambda i, k: (0, 0), pipeline_mode=resident),
        ],
        out_specs=pl.BlockSpec((tm, OUT_PAD), lambda i, k: (i, 0)),
        scratch_shapes=[pltpu.VMEM((tm, H1), jnp.float32)],   # fc1 f32 accumulator
        compiler_params=pltpu.CompilerParams(
            dimension_semantics=("parallel", "arbitrary"),    # batch across TCs, K is a reduction
            vmem_limit_bytes=vmem_limit,
        ),
        cost_estimate=pl.CostEstimate(
            flops=flops, transcendentals=0, bytes_accessed=bytes_accessed),
    )(x2d, w1, b1, w2, b2, w3p, b3p)

    return out_padded[:, :OUT_DIM]


def init_params(key):
    """Deterministic init matching nn.Linear shapes (weights stored transposed), f32."""
    k1, k2, k3, k4, k5, k6 = jax.random.split(key, 6)

    def uniform_init(k, shape, fan_in):
        bound = 1.0 / jnp.sqrt(fan_in)
        return jax.random.uniform(k, shape, jnp.float32, -bound, bound)

    w1 = uniform_init(k1, (IN_DIM, H1), IN_DIM)   # fc1.weight.T
    b1 = uniform_init(k2, (H1,), IN_DIM)          # fc1.bias
    w2 = uniform_init(k3, (H1, H2), H1)           # fc2.weight.T
    b2 = uniform_init(k4, (H2,), H1)              # fc2.bias
    w3 = uniform_init(k5, (H2, OUT_DIM), H2)      # fc3.weight.T
    b3 = uniform_init(k6, (OUT_DIM,), H2)         # fc3.bias
    return (w1, b1, w2, b2, w3, b3)


def prepare_params(params):
    """One-time prep (hoisted out of the per-call path):
    - cast weights to bf16 (halves weight DMA traffic),
    - pad fc3 weight/bias 5 -> 128 lanes,
    - reshape biases to (1, H) f32 rows."""
    w1, b1, w2, b2, w3, b3 = params
    w3p = jnp.zeros((H2, OUT_PAD), jnp.float32).at[:, :OUT_DIM].set(w3)
    b3p = jnp.zeros((1, OUT_PAD), jnp.float32).at[:, :OUT_DIM].set(b3)
    return (
        w1.astype(jnp.bfloat16),
        b1.reshape(1, H1).astype(jnp.float32),
        w2.astype(jnp.bfloat16),
        b2.reshape(1, H2).astype(jnp.float32),
        w3p.astype(jnp.bfloat16),
        b3p,
    )


def reference_forward_mirror(x_nchw, prepared_params):
    """Pure-JAX reference mirroring the kernel's bf16-input / f32-accumulate math."""
    w1, b1, w2, b2, w3p, b3p = prepared_params

    def bf(a):
        return a.astype(jnp.bfloat16).astype(jnp.float32)

    x = x_nchw.reshape(x_nchw.shape[0], IN_DIM)
    h1 = jnp.maximum(bf(x) @ bf(w1) + b1, 0.0)
    h2 = jnp.maximum(bf(h1) @ bf(w2) + b2, 0.0)
    out = bf(h2) @ bf(w3p) + b3p
    return out[:, :OUT_DIM]


def reference_forward_f32(x_nchw, params):
    """Full-precision reference of the original PyTorch forward (f32 everywhere)."""
    w1, b1, w2, b2, w3, b3 = params
    x = x_nchw.reshape(x_nchw.shape[0], IN_DIM).astype(jnp.float32)
    x = jnp.maximum(x @ w1 + b1, 0.0)
    x = jnp.maximum(x @ w2 + b2, 0.0)
    return x @ w3 + b3


if __name__ == "__main__":
    key = jax.random.PRNGKey(0)
    kx, kx2, kp = jax.random.split(key, 3)

    params = init_params(kp)
    prepared = prepare_params(params)

    # --- Small batch (B=2): single batch tile, K-chunked fc1 (the latency path) ---
    B = 2
    x = jax.random.normal(kx, (B, 1, 64, 64), jnp.float32)
    out = jax.block_until_ready(fabric_defect_forward(x, prepared))
    assert out.shape == (B, OUT_DIM), out.shape
    ref_mirror = reference_forward_mirror(x, prepared)
    assert jnp.allclose(out, ref_mirror, atol=5e-3, rtol=5e-3), (out, ref_mirror)
    ref_f32 = reference_forward_f32(x, params)
    assert jnp.allclose(out, ref_f32, atol=1e-1, rtol=1e-1), (out, ref_f32)

    # --- Larger batch (B=512): batch-tiled / pipelined grid path, f32 input ---
    B2 = 512
    x_big = jax.random.normal(kx2, (B2, 1, 64, 64), jnp.float32)
    out_big = jax.block_until_ready(fabric_defect_forward(x_big, prepared))
    assert out_big.shape == (B2, OUT_DIM), out_big.shape
    assert jnp.allclose(out_big, reference_forward_mirror(x_big, prepared),
                        atol=5e-3, rtol=5e-3)

    # --- Same batch with a bf16 activation stream (upstream-producer fast path) ---
    x_bf16 = x_big.astype(jnp.bfloat16)
    out_bf16 = jax.block_until_ready(fabric_defect_forward(x_bf16, prepared))
    assert out_bf16.shape == (B2, OUT_DIM), out_bf16.shape
    assert jnp.allclose(out_bf16, reference_forward_mirror(x_bf16, prepared),
                        atol=5e-3, rtol=5e-3)

    print("KERNEL_OK")
</pallas_src>

<mosaic_0001>
module attributes {stable_mosaic.version = 11 : i64} {
  func.func @mlp_kernel(%arg0: i32, %arg1: i32, %arg2: memref<2x1024xf32, #tpu.memory_space<vmem>>, %arg3: memref<1024x512xbf16, #tpu.memory_space<vmem>>, %arg4: memref<1x512xf32, #tpu.memory_space<vmem>>, %arg5: memref<512x256xbf16, #tpu.memory_space<vmem>>, %arg6: memref<1x256xf32, #tpu.memory_space<vmem>>, %arg7: memref<256x128xbf16, #tpu.memory_space<vmem>>, %arg8: memref<1x128xf32, #tpu.memory_space<vmem>>, %arg9: memref<2x128xf32, #tpu.memory_space<vmem>>, %arg10: memref<2x512xf32, #tpu.memory_space<vmem>>) attributes {dimension_semantics = [#tpu.dimension_semantics<parallel>, #tpu.dimension_semantics<arbitrary>], iteration_bounds = array<i64: 1, 4>, scalar_prefetch = 0 : i64, scratch_operands = 1 : i64, tpu.core_type = #tpu.core_type<tc>, window_params = [{transform_indices = @transform_0, window_bounds = array<i64: 2, 1024>}, {transform_indices = @transform_1, window_bounds = array<i64: 1024, 512>}, {pipeline_mode = #tpu.pipeline_mode<synchronous>, transform_indices = @transform_2, window_bounds = array<i64: 1, 512>}, {pipeline_mode = #tpu.pipeline_mode<synchronous>, transform_indices = @transform_3, window_bounds = array<i64: 512, 256>}, {pipeline_mode = #tpu.pipeline_mode<synchronous>, transform_indices = @transform_4, window_bounds = array<i64: 1, 256>}, {pipeline_mode = #tpu.pipeline_mode<synchronous>, transform_indices = @transform_5, window_bounds = array<i64: 256, 128>}, {pipeline_mode = #tpu.pipeline_mode<synchronous>, transform_indices = @transform_6, window_bounds = array<i64: 1, 128>}, {transform_indices = @transform_7, window_bounds = array<i64: 2, 128>}]} {
    %c0_i32 = arith.constant 0 : i32
    %0 = arith.cmpi eq, %arg1, %c0_i32 : i32
    %1 = arith.extui %0 : i1 to i32
    %c0_i32_0 = arith.constant 0 : i32
    %2 = arith.cmpi ne, %1, %c0_i32_0 : i32
    scf.if %2 {
      %cst_9 = arith.constant 0.000000e+00 : f32
      %13 = vector.broadcast %cst_9 : f32 to vector<2x512xf32>
      %c0_10 = arith.constant 0 : index
      %c0_11 = arith.constant 0 : index
      %14 = vector.load %arg10[%c0_10, %c0_11] : memref<2x512xf32, #tpu.memory_space<vmem>>, vector<2x512xf32>
      tpu.vector_store %arg10[%c0_10, %c0_11], %13 {strides = array<i32>} : memref<2x512xf32, #tpu.memory_space<vmem>>, vector<2x512xf32>,
    } else {
    }
    %c0 = arith.constant 0 : index
    %c0_1 = arith.constant 0 : index
    %3 = vector.load %arg2[%c0, %c0_1] : memref<2x1024xf32, #tpu.memory_space<vmem>>, vector<2x1024xf32>
    %4 = arith.truncf %3 : vector<2x1024xf32> to vector<2x1024xbf16>
    %c0_2 = arith.constant 0 : index
    %c0_3 = arith.constant 0 : index
    %5 = vector.load %arg10[%c0_2, %c0_3] : memref<2x512xf32, #tpu.memory_space<vmem>>, vector<2x512xf32>
    %c0_4 = arith.constant 0 : index
    %c0_5 = arith.constant 0 : index
    %6 = vector.load %arg3[%c0_4, %c0_5] : memref<1024x512xbf16, #tpu.memory_space<vmem>>, vector<1024x512xbf16>
    %cst = arith.constant dense<0.000000e+00> : vector<2x512xf32>
    %7 = tpu.matmul %4, %6, %cst {dimension_numbers = #tpu.dot_dimension_numbers<[1], [0], [0], [1], [0, 0, 1, 1], [], []>} : vector<2x1024xbf16>, vector<1024x512xbf16>, vector<2x512xf32> -> vector<2x512xf32>
    %8 = arith.addf %5, %7 : vector<2x512xf32>
    %c0_6 = arith.constant 0 : index
    %c0_7 = arith.constant 0 : index
    %9 = vector.load %arg10[%c0_6, %c0_7] : memref<2x512xf32, #tpu.memory_space<vmem>>, vector<2x512xf32>
    tpu.vector_store %arg10[%c0_6, %c0_7], %8 {strides = array<i32>} : memref<2x512xf32, #tpu.memory_space<vmem>>, vector<2x512xf32>,
    %c3_i32 = arith.constant 3 : i32
    %10 = arith.cmpi eq, %arg1, %c3_i32 : i32
    %11 = arith.extui %10 : i1 to i32
    %c0_i32_8 = arith.constant 0 : i32
    %12 = arith.cmpi ne, %11, %c0_i32_8 : i32
    scf.if %12 {
      %c0_9 = arith.constant 0 : index
      %c0_10 = arith.constant 0 : index
      %13 = vector.load %arg10[%c0_9, %c0_10] : memref<2x512xf32, #tpu.memory_space<vmem>>, vector<2x512xf32>
      %c0_11 = arith.constant 0 : index
      %c0_12 = arith.constant 0 : index
      %14 = vector.load %arg4[%c0_11, %c0_12] : memref<1x512xf32, #tpu.memory_space<vmem>>, vector<1x512xf32>
      %15 = vector.broadcast %14 : vector<1x512xf32> to vector<2x512xf32>
      %16 = arith.addf %13, %15 : vector<2x512xf32>
      %cst_13 = arith.constant 0.000000e+00 : f32
      %17 = vector.broadcast %cst_13 : f32 to vector<2x512xf32>
      %18 = arith.maximumf %16, %17 : vector<2x512xf32>
      %19 = arith.truncf %18 : vector<2x512xf32> to vector<2x512xbf16>
      %c0_14 = arith.constant 0 : index
      %c0_15 = arith.constant 0 : index
      %20 = vector.load %arg5[%c0_14, %c0_15] : memref<512x256xbf16, #tpu.memory_space<vmem>>, vector<512x256xbf16>
      %cst_16 = arith.constant dense<0.000000e+00> : vector<2x256xf32>
      %21 = tpu.matmul %19, %20, %cst_16 {dimension_numbers = #tpu.dot_dimension_numbers<[1], [0], [0], [1], [0, 0, 1, 1], [], []>} : vector<2x512xbf16>, vector<512x256xbf16>, vector<2x256xf32> -> vector<2x256xf32>
      %c0_17 = arith.constant 0 : index
      %c0_18 = arith.constant 0 : index
      %22 = vector.load %arg6[%c0_17, %c0_18] : memref<1x256xf32, #tpu.memory_space<vmem>>, vector<1x256xf32>
      %23 = vector.broadcast %22 : vector<1x256xf32> to vector<2x256xf32>
      %24 = arith.addf %21, %23 : vector<2x256xf32>
      %cst_19 = arith.constant 0.000000e+00 : f32
      %25 = vector.broadcast %cst_19 : f32 to vector<2x256xf32>
      %26 = arith.maximumf %24, %25 : vector<2x256xf32>
      %27 = arith.truncf %26 : vector<2x256xf32> to vector<2x256xbf16>
      %c0_20 = arith.constant 0 : index
      %c0_21 = arith.constant 0 : index
      %28 = vector.load %arg7[%c0_20, %c0_21] : memref<256x128xbf16, #tpu.memory_space<vmem>>, vector<256x128xbf16>
      %cst_22 = arith.constant dense<0.000000e+00> : vector<2x128xf32>
      %29 = tpu.matmul %27, %28, %cst_22 {dimension_numbers = #tpu.dot_dimension_numbers<[1], [0], [0], [1], [0, 0, 1, 1], [], []>} : vector<2x256xbf16>, vector<256x128xbf16>, vector<2x128xf32> -> vector<2x128xf32>
      %c0_23 = arith.constant 0 : index
      %c0_24 = arith.constant 0 : index
      %30 = vector.load %arg8[%c0_23, %c0_24] : memref<1x128xf32, #tpu.memory_space<vmem>>, vector<1x128xf32>
      %31 = vector.broadcast %30 : vector<1x128xf32> to vector<2x128xf32>
      %32 = arith.addf %29, %31 : vector<2x128xf32>
      %c0_25 = arith.constant 0 : index
      %c0_26 = arith.constant 0 : index
      %33 = vector.load %arg9[%c0_25, %c0_26] : memref<2x128xf32, #tpu.memory_space<vmem>>, vector<2x128xf32>
      tpu.vector_store %arg9[%c0_25, %c0_26], %32 {strides = array<i32>} : memref<2x128xf32, #tpu.memory_space<vmem>>, vector<2x128xf32>,
    } else {
    }
    return
  }
  func.func @transform_0(%arg0: i32, %arg1: i32) -> (i32, i32) {
    %c0_i32 = arith.constant 0 : i32
    return %arg0, %arg1 : i32, i32
  }
  func.func @transform_1(%arg0: i32, %arg1: i32) -> (i32, i32) {
    %c0_i32 = arith.constant 0 : i32
    %c0_i32_0 = arith.constant 0 : i32
    return %arg1, %c0_i32 : i32, i32
  }
  func.func @transform_2(%arg0: i32, %arg1: i32) -> (i32, i32) {
    %c0_i32 = arith.constant 0 : i32
    %c0_i32_0 = arith.constant 0 : i32
    %c0_i32_1 = arith.constant 0 : i32
    return %c0_i32, %c0_i32_0 : i32, i32
  }
  func.func @transform_3(%arg0: i32, %arg1: i32) -> (i32, i32) {
    %c0_i32 = arith.constant 0 : i32
    %c0_i32_0 = arith.constant 0 : i32
    %c0_i32_1 = arith.constant 0 : i32
    return %c0_i32, %c0_i32_0 : i32, i32
  }
  func.func @transform_4(%arg0: i32, %arg1: i32) -> (i32, i32) {
    %c0_i32 = arith.constant 0 : i32
    %c0_i32_0 = arith.constant 0 : i32
    %c0_i32_1 = arith.constant 0 : i32
    return %c0_i32, %c0_i32_0 : i32, i32
  }
  func.func @transform_5(%arg0: i32, %arg1: i32) -> (i32, i32) {
    %c0_i32 = arith.constant 0 : i32
    %c0_i32_0 = arith.constant 0 : i32
    %c0_i32_1 = arith.constant 0 : i32
    return %c0_i32, %c0_i32_0 : i32, i32
  }
  func.func @transform_6(%arg0: i32, %arg1: i32) -> (i32, i32) {
    %c0_i32 = arith.constant 0 : i32
    %c0_i32_0 = arith.constant 0 : i32
    %c0_i32_1 = arith.constant 0 : i32
    return %c0_i32, %c0_i32_0 : i32, i32
  }
  func.func @transform_7(%arg0: i32, %arg1: i32) -> (i32, i32) {
    %c0_i32 = arith.constant 0 : i32
    %c0_i32_0 = arith.constant 0 : i32
    return %arg0, %c0_i32 : i32, i32
  }
}

</mosaic_0001>

<bundles_post_ra>
// kernel: tpu_custom_call.1
= control target key start
LH: loop header
LB: loop body
LE: loop exit
PB: predicated region body
PF: predicated region fallthrough
CT: control target
= control target key end

     0   :  { %s6224_s0 = inlined_call_operand.hbm [shape: f32[2,4096], index: 0, kind: input, shape index: {}]   ;;  %s6225_s1 = inlined_call_operand.hbm [shape: bf16[4096,512], index: 1, kind: input, shape index: {}]   ;;  %s6226_s2 = inlined_call_operand.hbm [shape: f32[1,512], index: 2, kind: input, shape index: {}]   ;;  %s6227_s3 = inlined_call_operand.hbm [shape: bf16[512,256], index: 3, kind: input, shape index: {}]   ;;  %s6228_s4 = inlined_call_operand.hbm [shape: f32[1,256], index: 4, kind: input, shape index: {}]   ;;  %s6229_s5 = inlined_call_operand.hbm [shape: bf16[256,128], index: 5, kind: input, shape index: {}]   ;;  %s6230_s6 = inlined_call_operand.hbm [shape: f32[1,128], index: 6, kind: input, shape index: {}]   ;;  %s6231_s7 = inlined_call_operand.hbm [shape: f32[2,128], index: 7, kind: output, shape index: {}]  }
   0x1   :  { %6232 = sst [smem:[#allocation22_spill]] %s6224_s0 }
   0x2   :  { %6233 = sst [smem:[#allocation23_spill]] %s6226_s2 }
   0x3   :  { %6234 = sst [smem:[#allocation24_spill]] %s6227_s3 }
   0x4   :  { %6235 = sst [smem:[#allocation25_spill]] %s6228_s4 }
   0x5   :  { %12 = vsyncpa [#allocation4], 0 }
   0x6   :  { %14 = vsyncpa [#allocation4 + $0x1], 0 }
   0x7   :  { %15 = vsyncpa [#allocation7], 0 }
   0x8   :  { %17 = vsyncpa [#allocation7 + $0x1], 0 }
   0x9   :  { %18 = vsyncpa [#allocation10], 0 }
   0xa   :  { %19 = vsyncpa [#allocation13], 0 }
   0xb   :  { %20 = vsyncpa [#allocation5], 0  ;;  %s5469_s24 = smov 0   ;;  %s5471_s25 = smov 0  }
   0xc   :  { %s5473_s26 = smov 0   ;;  %s5475_s27 = smov 0  }
   0xd   :  { %s5477_s28 = smov 0   ;;  %s5479_s29 = smov 0  }
   0xe LB: > { %s5500_s30 = sadd.s32 4294967295, %s5414_s29   ;;  %p3269_p0 = scmp.ge.s32.totalorder %s5414_s29, 1  ;;  %s5414_s29 = sphi %s5479_s29, %s26_s29   ;;  %s5410_s28 = sphi %s5477_s28, %s6249_s28   ;;  %s5406_s27 = sphi %s5475_s27, %s6248_s27   ;;  %s5402_s26 = sphi %s5473_s26, %s6247_s26   ;;  %s5398_s25 = sphi %s5471_s25, %s6246_s25   ;;  %s5394_s24 = sphi %s5469_s24, %s6245_s24  }
   0xf   : > { %p61_p1 = scmp.eq.s32.totalorder %s5500_s30, 0  ;;  %p228_p2 = scmp.lt.s32.totalorder %s5414_s29, 5 }
  0x10   : > { %s6236_s2 = sld [smem:[#allocation23_spill]]  ;;  %s5416_s12 = smov [#allocation8]  }
  0x11   : > { %p5508_p3 = pnand %p3269_p0, %p228_p2  ;;  %s242_s13 = sshll.u32 %s5416_s12, 4  ;;  %s243_s13 = int_to_ptr.vmem [resolvable:$true] %s242_s13 }
  0x12   : > { %s6238_s3 = sld [smem:[#allocation24_spill]]  ;;  %s5417_s18 = smov [#allocation9]  }
  0x13   : > { %p5008_p4 = pneg %p5508_p3  ;;  %s253_s19 = sshll.u32 %s5417_s18, 4  ;;  %s254_s19 = int_to_ptr.vmem [resolvable:$true] %s253_s19 }
  0x14   : > { %s5418_s20 = smov 128   ;;  %s5419_s21 = smov 8  }
  0x15   : > { %p5519_p5 = pnand %p5008_p4, %p61_p1  ;;  %s277_s8 = sshll.u32 %s6229_s5, 4  ;;  %s278_s8 = int_to_ptr.hbm [resolvable:$true] %s277_s8 }
  0x16   : > { %s240_s10 = sshll.u32 %s6236_s2, 4  ;;  %s5420_s9 = smov [#allocation12]   ;;  %s241_s10 = int_to_ptr.hbm [resolvable:$true] %s240_s10 }
  0x17   : > { %5011 = dma.hbm_to_vmem [thread:$0]  (!%p5519_p5), %s241_s10, 64, %s243_s13, [#allocation7]  }
  0x18   : > { %s251_s16 = sshll.u32 %s6238_s3, 4  ;;  %s279_s12 = sshll.u32 %s5420_s9, 4  ;;  %s252_s16 = int_to_ptr.hbm [resolvable:$true] %s251_s16  ;;  %s280_s12 = int_to_ptr.vmem [resolvable:$true] %s279_s12 }
  0x19   : > { %5014 = dma.hbm_to_vmem [thread:$0]  (!%p5519_p5), %s252_s16, 8192, %s254_s19, [#allocation10], %s5418_s20, %s5418_s20, %s5419_s21  }
  0x1a   : > { %s6240_s4 = sld [smem:[#allocation25_spill]]  ;;  %s5421_s13 = smov 64  }
  0x1b   : > { %s5422_s18 = smov 4   ;;  %s5423_s16 = smov [#allocation11]  }
  0x1c   : > { %5020 = dma.hbm_to_vmem [thread:$0]  (!%p5519_p5), %s278_s8, 2048, %s280_s12, [#allocation13], %s5421_s13, %s5421_s13, %s5422_s18  }
  0x1d   : > { %s268_s19 = sshll.u32 %s5423_s16, 4  ;;  %s292_s22 = sshll.u32 %s6230_s6, 4  ;;  %s269_s19 = int_to_ptr.vmem [resolvable:$true] %s268_s19  ;;  %s293_s22 = int_to_ptr.hbm [resolvable:$true] %s292_s22 }
  0x1e   : > { %s5424_s23 = smov [#allocation14]   ;;  %s35_s9 = sadd.s32 1, %s5410_s28 }
  0x1f   : > { %s294_s8 = sshll.u32 %s5424_s23, 4  ;;  %p36_p6 = scmp.ge.s32.totalorder %s35_s9, 4  ;;  %s295_s8 = int_to_ptr.vmem [resolvable:$true] %s294_s8 }
  0x20   : > { %s266_s10 = sshll.u32 %s6240_s4, 4  ;;  %s47_s12 = sadd.s32 1, %s5402_s26  ;;  %s267_s10 = int_to_ptr.hbm [resolvable:$true] %s266_s10 }
  0x21   : > { %5017 = dma.hbm_to_vmem [thread:$0]  (!%p5519_p5), %s267_s10, 32, %s269_s19, [#allocation10]  }
  0x22   : > { %5023 = dma.hbm_to_vmem [thread:$0]  (!%p5519_p5), %s293_s22, 16, %s295_s8, [#allocation13]  }
  0x23   : > { %p54_p7 = scmp.ne.s32.totalorder %s5402_s26, %s5398_s25  ;;  %p55_p8 = scmp.eq.s32.totalorder %s5414_s29, 0 }
  0x24   : > { %s6251_s9 = smov (%p36_p6, %s35_s9), 0  ;;  %p60_p10 = scmp.ne.s32.totalorder %s5398_s25, %s5394_s24 }
  0x25   : > { %p5549_p9 = por %p55_p8, %p54_p7  ;;  %s43_s15 = ssub.s32 %s5410_s28, %s6251_s9 }
  0x26   : > { %p5036_p11 = scmp.lt.s32.totalorder %s5414_s29, 4  ;;  %p45_p12 = scmp.eq.s32.totalorder %s43_s15, 0 }
  0x27   : > { %p5560_p13 = por %p61_p1, %p60_p10  ;;  %s305_s10 = sand.u32 1, %s5402_s26  }
  0x28   : > { %s4641_s13 = sshll.u32 %s5410_s28, 4  ;;  %s3276_s16 = sshll.u32 %s305_s10, 4 }
  0x29   : > { %s5567_s18 = scalar_select %p45_p12, %s5402_s26, %s47_s12  }
  0x2a   : > { %s6243_s0 = sld [smem:[#allocation22_spill]]  ;;  %s309_s22 = scalar_lea.vmem [#allocation3], %s3276_s16 }
  0x2b   : > { %s320_s23 = sshll.u32 %s309_s22, 4  ;;  %p5576_p0 = pnand %p5036_p11, %p5549_p9  ;;  %s321_s23 = int_to_ptr.vmem [resolvable:$true] %s320_s23 }
  0x2c   : > { %s3279_s12 = sshll.u32 %s305_s10, 11  ;;  %s4643_s15 = sshll.u32 %s5410_s28, 11 }
  0x2d   : > { %s331_s2 = scalar_lea.vmem [#allocation6], %s3279_s12  ;;  %s306_s4 = scalar_lea.sflag [#allocation4], %s305_s10 }
  0x2e   : > { %s340_s3 = sshll.u32 %s331_s2, 4  ;;  %s337_s14 = scalar_lea.hbm %s6225_s1, %s4643_s15  ;;  %s341_s3 = int_to_ptr.vmem [resolvable:$true] %s340_s3 }
  0x2f   : > { %s338_s20 = sshll.u32 %s337_s14, 4  ;;  %s5425_s22 = smov 256   ;;  %s339_s20 = int_to_ptr.hbm [resolvable:$true] %s338_s20 }
  0x30   : > { %s316_s21 = scalar_lea.hbm %s6243_s0, %s4641_s13  ;;  %s327_s13 = sand.u32 1, %s5414_s29  }
  0x31   : > { %s318_s24 = sshll.u32 %s316_s21, 4  ;;  %s328_s21 = scalar_lea.sflag [#allocation7], %s327_s13  ;;  %s319_s24 = int_to_ptr.hbm [resolvable:$true] %s318_s24 }
  0x32   : > { %5027 = dma.hbm_to_vmem [thread:$0]  (!%p5576_p0), %s319_s24, 256, %s321_s23, %s306_s4  }
  0x33   : > { %s5426_s0 = smov 16   ;;  %352 = sbr.rel (%p5508_p3) target bundleno = 829 (0x33d), region = 48 }
  0x34   : > { %5030 = dma.hbm_to_vmem [thread:$0]  (!%p5576_p0), %s339_s20, 32768, %s341_s3, %s328_s21, %s5425_s22, %s5425_s22, %s5426_s0  }
  0x35   : > { %s354_s2 = sand.u32 (!%p5508_p3), 1, %s5398_s25  }
  0x36   : > { %s3284_s4 = sshll.u32 (!%p5508_p3), %s354_s2, 4  ;;  %s355_s10 = scalar_lea.sflag (!%p5508_p3), [#allocation4], %s354_s2 }
  0x37   : > { %s5592_s24 = scalar_lea.vmem (!%p5508_p3), [#allocation3], %s3284_s4 }
  0x38   : > { %5369 = dma.done.wait (%p5560_p13), %s355_s10, 256  }
  0x39   : > { %5371 = vsyncadd (%p5560_p13), %s355_s10, 4294967040  ;;  %s364_s23 = sand.u32 1, %s5500_s30   ;;  %s3285_s8 = sshll.u32 %s354_s2, 11 }
  0x3a   : > { %s365_s0 = scalar_lea.sflag [#allocation7], %s364_s23  ;;  %s5599_s3 = scalar_lea.vmem [#allocation6], %s3285_s8 }
  0x3b   : > { %5373 = dma.done.wait (%p5560_p13), %s365_s0, 32768  }
  0x3c   : > { %5375 = vsyncadd (%p5560_p13), %s365_s0, 4294934528 }
  0x3d   : > { %5377 = dma.done.wait (%p61_p1), [#allocation7], 64  }
  0x3e   : > { %5379 = vsyncadd (%p61_p1), [#allocation7], 4294967232 }
  0x3f   : > { %5381 = dma.done.wait (%p61_p1), [#allocation10], 8224  }
  0x40   : > { %5383 = vsyncadd (%p61_p1), [#allocation10], 4294959072 }
  0x41   : > { %5385 = dma.done.wait (%p61_p1), [#allocation13], 2064  }
  0x42   : > { %5387 = vsyncadd (%p61_p1), [#allocation13], 4294965232  ;;  %p3291_p2 = scmp.ne.s32.totalorder %s5406_s27, 0 }
  0x44   : > { %430 = sbr.rel (%p3291_p2) target bundleno = 75 (0x4b), region = 80 }
  0x49   : > { %v5427_v0 = vmov 0.0  }
  0x4a   : > { %431 = vst [vmem:[#allocation2] sm:$0xff] %v5427_v0 }
  0x4b PF: > { %v3406_v1 = vld [vmem:[%s5599_s3 + $0xe0] sm:$0xf]  ;;  %v4674_v2 = vld [vmem:[%s5599_s3 + $0xec] sm:$0xf0]  ;;  %vm2423_vm0 = vcmask 1041408   ;;  %vm2425_vm1 = vcmask 1045508  }
  0x4c   : > { %v3534_v3 = vld [vmem:[%s5599_s3 + $0x1e0] sm:$0xf]  ;;  %v3407_v4 = vor.u32 %v4674_v2, %v3406_v1  ;;  %v4706_v5 = vld [vmem:[%s5599_s3 + $0x1ec] sm:$0xf0]  ;;  %vm2427_vm2 = vcmask 1043456   ;;  %p4316_p1 = scmp.ne.s32.totalorder %s5406_s27, 3 }
  0x4d   : > { %v3662_v6 = vld [vmem:[%s5599_s3 + $0x2e0] sm:$0xf]  ;;  %v4738_v7 = vld [vmem:[%s5599_s3 + $0x2ec] sm:$0xf0]  ;;  %v3535_v8 = vor.u32 %v4706_v5, %v3534_v3 }
  0x4e   : > { %v3663_v9 = vor.u32 %v4738_v7, %v3662_v6  ;;  %v3790_v10 = vld [vmem:[%s5599_s3 + $0x3e0] sm:$0xf]  ;;  %v4770_v11 = vld [vmem:[%s5599_s3 + $0x3ec] sm:$0xf0]  ;;  %2000 = vmatpush.bf16.msra.mxu0 %v3407_v4 }
  0x4f   : > { %v3390_v12 = vld [vmem:[%s5599_s3 + $0xc0] sm:$0xf]  ;;  %v3791_v13 = vor.u32 %v4770_v11, %v3790_v10  ;;  %v4670_v14 = vld [vmem:[%s5599_s3 + $0xcc] sm:$0xf0]  ;;  %2013 = vmatpush.bf16.msra.mxu1 %v3535_v8 }
  0x50   : > { %v3518_v15 = vld [vmem:[%s5599_s3 + $0x1c0] sm:$0xf]  ;;  %v4702_v16 = vld [vmem:[%s5599_s3 + $0x1cc] sm:$0xf0]  ;;  %2026 = vmatpush.bf16.msra.mxu2 %v3663_v9  ;;  %v3391_v17 = vor.u32 %v4670_v14, %v3390_v12 }
  0x51   : > { %v3519_v18 = vor.u32 %v4702_v16, %v3518_v15  ;;  %v3646_v19 = vld [vmem:[%s5599_s3 + $0x2c0] sm:$0xf]  ;;  %v4734_v20 = vld [vmem:[%s5599_s3 + $0x2cc] sm:$0xf0]  ;;  %2039 = vmatpush.bf16.msra.mxu3 %v3791_v13 }
  0x52   : > { %v3774_v21 = vld [vmem:[%s5599_s3 + $0x3c0] sm:$0xf]  ;;  %v3647_v22 = vor.u32 %v4734_v20, %v3646_v19  ;;  %v4766_v23 = vld [vmem:[%s5599_s3 + $0x3cc] sm:$0xf0]  ;;  %2001 = vmatpush.bf16.msra.mxu0 %v3391_v17 }
  0x53   : > { %v3374_v24 = vld [vmem:[%s5599_s3 + $0xa0] sm:$0xf]  ;;  %v4666_v25 = vld [vmem:[%s5599_s3 + $0xac] sm:$0xf0]  ;;  %v3775_v26 = vor.u32 %v4766_v23, %v3774_v21  ;;  %2014 = vmatpush.bf16.msra.mxu1 %v3519_v18 }
  0x54   : > { %v3502_v27 = vld [vmem:[%s5599_s3 + $0x1a0] sm:$0xf]  ;;  %v4698_v28 = vld [vmem:[%s5599_s3 + $0x1ac] sm:$0xf0]  ;;  %v3375_v30 = vor.u32 %v4666_v25, %v3374_v24  ;;  %2027 = vmatpush.bf16.msra.mxu2 %v3647_v22 }
  0x55   : > { %v3630_v29 = vld [vmem:[%s5599_s3 + $0x2a0] sm:$0xf]  ;;  %v4730_v31 = vld [vmem:[%s5599_s3 + $0x2ac] sm:$0xf0]  ;;  %v3503_v34 = vor.u32 %v4698_v28, %v3502_v27  ;;  %2040 = vmatpush.bf16.msra.mxu3 %v3775_v26 }
  0x56   : > { %v3758_v32 = vld [vmem:[%s5599_s3 + $0x3a0] sm:$0xf]  ;;  %v4762_v33 = vld [vmem:[%s5599_s3 + $0x3ac] sm:$0xf0]  ;;  %v3631_v35 = vor.u32 %v4730_v31, %v3630_v29  ;;  %2002 = vmatpush.bf16.msra.mxu0 %v3375_v30 }
  0x57   : > { %v3358_v36 = vld [vmem:[%s5599_s3 + $0x80] sm:$0xf]  ;;  %v4662_v37 = vld [vmem:[%s5599_s3 + $0x8c] sm:$0xf0]  ;;  %v3759_v39 = vor.u32 %v4762_v33, %v3758_v32  ;;  %2015 = vmatpush.bf16.msra.mxu1 %v3503_v34 }
  0x58   : > { %v3486_v38 = vld [vmem:[%s5599_s3 + $0x180] sm:$0xf]  ;;  %v4694_v40 = vld [vmem:[%s5599_s3 + $0x18c] sm:$0xf0]  ;;  %v3359_v45 = vor.u32 %v4662_v37, %v3358_v36  ;;  %2028 = vmatpush.bf16.msra.mxu2 %v3631_v35 }
  0x59   : > { %v3614_v41 = vld [vmem:[%s5599_s3 + $0x280] sm:$0xf]  ;;  %v4726_v42 = vld [vmem:[%s5599_s3 + $0x28c] sm:$0xf0]  ;;  %v3487_v46 = vor.u32 %v4694_v40, %v3486_v38  ;;  %2041 = vmatpush.bf16.msra.mxu3 %v3759_v39 }
  0x5a   : > { %v3742_v43 = vld [vmem:[%s5599_s3 + $0x380] sm:$0xf]  ;;  %v4758_v44 = vld [vmem:[%s5599_s3 + $0x38c] sm:$0xf0]  ;;  %v3615_v47 = vor.u32 %v4726_v42, %v3614_v41  ;;  %2003 = vmatpush.bf16.msra.mxu0 %v3359_v45 }
  0x5b   : > { %v3342_v48 = vld [vmem:[%s5599_s3 + $0x60] sm:$0xf]  ;;  %v4658_v49 = vld [vmem:[%s5599_s3 + $0x6c] sm:$0xf0]  ;;  %v3743_v51 = vor.u32 %v4758_v44, %v3742_v43  ;;  %2016 = vmatpush.bf16.msra.mxu1 %v3487_v46 }
  0x5c   : > { %v3470_v50 = vld [vmem:[%s5599_s3 + $0x160] sm:$0xf]  ;;  %v4690_v52 = vld [vmem:[%s5599_s3 + $0x16c] sm:$0xf0]  ;;  %v3343_v57 = vor.u32 %v4658_v49, %v3342_v48  ;;  %2029 = vmatpush.bf16.msra.mxu2 %v3615_v47 }
  0x5d   : > { %v3598_v53 = vld [vmem:[%s5599_s3 + $0x260] sm:$0xf]  ;;  %v4722_v54 = vld [vmem:[%s5599_s3 + $0x26c] sm:$0xf0]  ;;  %v3471_v58 = vor.u32 %v4690_v52, %v3470_v50  ;;  %2042 = vmatpush.bf16.msra.mxu3 %v3743_v51 }
  0x5e   : > { %v3726_v55 = vld [vmem:[%s5599_s3 + $0x360] sm:$0xf]  ;;  %v4754_v56 = vld [vmem:[%s5599_s3 + $0x36c] sm:$0xf0]  ;;  %v3599_v59 = vor.u32 %v4722_v54, %v3598_v53  ;;  %2004 = vmatpush.bf16.msra.mxu0 %v3343_v57 }
  0x5f   : > { %v3326_v60 = vld [vmem:[%s5599_s3 + $0x40] sm:$0xf]  ;;  %v4654_v61 = vld [vmem:[%s5599_s3 + $0x4c] sm:$0xf0]  ;;  %v3727_v63 = vor.u32 %v4754_v56, %v3726_v55  ;;  %2017 = vmatpush.bf16.msra.mxu1 %v3471_v58 }
  0x60   : > { %v3454_v62 = vld [vmem:[%s5599_s3 + $0x140] sm:$0xf]  ;;  %v4686_v0 = vld [vmem:[%s5599_s3 + $0x14c] sm:$0xf0]  ;;  %v3327_v5 = vor.u32 %v4654_v61, %v3326_v60  ;;  %2030 = vmatpush.bf16.msra.mxu2 %v3599_v59 }
  0x61   : > { %v3582_v1 = vld [vmem:[%s5599_s3 + $0x240] sm:$0xf]  ;;  %v4718_v2 = vld [vmem:[%s5599_s3 + $0x24c] sm:$0xf0]  ;;  %v3455_v6 = vor.u32 %v4686_v0, %v3454_v62  ;;  %2043 = vmatpush.bf16.msra.mxu3 %v3727_v63 }
  0x62   : > { %v3710_v3 = vld [vmem:[%s5599_s3 + $0x340] sm:$0xf]  ;;  %v4750_v4 = vld [vmem:[%s5599_s3 + $0x34c] sm:$0xf0]  ;;  %v3583_v7 = vor.u32 %v4718_v2, %v3582_v1  ;;  %2005 = vmatpush.bf16.msra.mxu0 %v3327_v5 }
  0x63   : > { %v3310_v8 = vld [vmem:[%s5599_s3 + $0x20] sm:$0xf]  ;;  %v4650_v9 = vld [vmem:[%s5599_s3 + $0x2c] sm:$0xf0]  ;;  %v3711_v11 = vor.u32 %v4750_v4, %v3710_v3  ;;  %2018 = vmatpush.bf16.msra.mxu1 %v3455_v6 }
  0x64   : > { %v3438_v10 = vld [vmem:[%s5599_s3 + $0x120] sm:$0xf]  ;;  %v4682_v12 = vld [vmem:[%s5599_s3 + $0x12c] sm:$0xf0]  ;;  %v3311_v17 = vor.u32 %v4650_v9, %v3310_v8  ;;  %2031 = vmatpush.bf16.msra.mxu2 %v3583_v7 }
  0x65   : > { %v3566_v13 = vld [vmem:[%s5599_s3 + $0x220] sm:$0xf]  ;;  %v4714_v14 = vld [vmem:[%s5599_s3 + $0x22c] sm:$0xf0]  ;;  %v3439_v20 = vor.u32 %v4682_v12, %v3438_v10  ;;  %2044 = vmatpush.bf16.msra.mxu3 %v3711_v11 }
  0x66   : > { %v3694_v15 = vld [vmem:[%s5599_s3 + $0x320] sm:$0xf]  ;;  %v4746_v16 = vld [vmem:[%s5599_s3 + $0x32c] sm:$0xf0]  ;;  %v3567_v21 = vor.u32 %v4714_v14, %v3566_v13  ;;  %2006 = vmatpush.bf16.msra.mxu0 %v3311_v17 }
  0x67   : > { %v3294_v18 = vld [vmem:[%s5599_s3] sm:$0xf]  ;;  %v4646_v19 = vld [vmem:[%s5599_s3 + $0xc] sm:$0xf0]  ;;  %v3695_v25 = vor.u32 %v4746_v16, %v3694_v15  ;;  %2019 = vmatpush.bf16.msra.mxu1 %v3439_v20 }
  0x68   : > { %v3422_v22 = vld [vmem:[%s5599_s3 + $0x100] sm:$0xf]  ;;  %v4678_v23 = vld [vmem:[%s5599_s3 + $0x10c] sm:$0xf0]  ;;  %v3295_v32 = vor.u32 %v4646_v19, %v3294_v18  ;;  %2032 = vmatpush.bf16.msra.mxu2 %v3567_v21 }
  0x69   : > { %v3550_v24 = vld [vmem:[%s5599_s3 + $0x200] sm:$0xf]  ;;  %v4710_v26 = vld [vmem:[%s5599_s3 + $0x20c] sm:$0xf0]  ;;  %v3423_v36 = vor.u32 %v4678_v23, %v3422_v22  ;;  %2045 = vmatpush.bf16.msra.mxu3 %v3695_v25 }
  0x6a   : > { %v3678_v27 = vld [vmem:[%s5599_s3 + $0x300] sm:$0xf]  ;;  %v4742_v28 = vld [vmem:[%s5599_s3 + $0x30c] sm:$0xf0]  ;;  %v3551_v37 = vor.u32 %v4710_v26, %v3550_v24  ;;  %2007 = vmatpush.bf16.msra.mxu0 %v3295_v32 }
  0x6b   : > { %v3918_v29 = vld [vmem:[%s5599_s3 + $0x4e0] sm:$0xf]  ;;  %v4802_v30 = vld [vmem:[%s5599_s3 + $0x4ec] sm:$0xf0]  ;;  %v3679_v40 = vor.u32 %v4742_v28, %v3678_v27  ;;  %2020 = vmatpush.bf16.msra.mxu1 %v3423_v36 }
  0x6c   : > { %v4046_v31 = vld [vmem:[%s5599_s3 + $0x5e0] sm:$0xf]  ;;  %v4834_v33 = vld [vmem:[%s5599_s3 + $0x5ec] sm:$0xf0]  ;;  %v3919_v41 = vor.u32 %v4802_v30, %v3918_v29  ;;  %2033 = vmatpush.bf16.msra.mxu2 %v3551_v37 }
  0x6d   : > { %v4174_v34 = vld [vmem:[%s5599_s3 + $0x6e0] sm:$0xf]  ;;  %v4866_v35 = vld [vmem:[%s5599_s3 + $0x6ec] sm:$0xf0]  ;;  %v4047_v42 = vor.u32 %v4834_v33, %v4046_v31  ;;  %2046 = vmatpush.bf16.msra.mxu3 %v3679_v40 }
  0x6e   : > { %v4302_v38 = vld [vmem:[%s5599_s3 + $0x7e0] sm:$0xf]  ;;  %v4898_v39 = vld [vmem:[%s5599_s3 + $0x7ec] sm:$0xf0]  ;;  %v4175_v43 = vor.u32 %v4866_v35, %v4174_v34  ;;  %2052 = vmatpush.bf16.msrb.mxu0 %v3919_v41 }
  0x6f   : > { %v3902_v44 = vld [vmem:[%s5599_s3 + $0x4c0] sm:$0xf]  ;;  %v4798_v45 = vld [vmem:[%s5599_s3 + $0x4cc] sm:$0xf0]  ;;  %v4303_v47 = vor.u32 %v4898_v39, %v4302_v38  ;;  %2065 = vmatpush.bf16.msrb.mxu1 %v4047_v42 }
  0x70   : > { %v4030_v46 = vld [vmem:[%s5599_s3 + $0x5c0] sm:$0xf]  ;;  %v4830_v48 = vld [vmem:[%s5599_s3 + $0x5cc] sm:$0xf0]  ;;  %v3903_v53 = vor.u32 %v4798_v45, %v3902_v44  ;;  %2078 = vmatpush.bf16.msrb.mxu2 %v4175_v43 }
  0x71   : > { %v4158_v49 = vld [vmem:[%s5599_s3 + $0x6c0] sm:$0xf]  ;;  %v4862_v50 = vld [vmem:[%s5599_s3 + $0x6cc] sm:$0xf0]  ;;  %v4031_v56 = vor.u32 %v4830_v48, %v4030_v46  ;;  %2091 = vmatpush.bf16.msrb.mxu3 %v4303_v47 }
  0x72   : > { %v4286_v51 = vld [vmem:[%s5599_s3 + $0x7c0] sm:$0xf]  ;;  %v4894_v52 = vld [vmem:[%s5599_s3 + $0x7cc] sm:$0xf0]  ;;  %v4159_v57 = vor.u32 %v4862_v50, %v4158_v49  ;;  %2053 = vmatpush.bf16.msrb.mxu0 %v3903_v53  ;;  %v433_v53 = vld [vmem:[%s5592_s24 + $0x8] sm:$0xff] }
  0x73   : > { %v3886_v54 = vld [vmem:[%s5599_s3 + $0x4a0] sm:$0xf]  ;;  %v4794_v55 = vld [vmem:[%s5599_s3 + $0x4ac] sm:$0xf0]  ;;  %v4287_v61 = vor.u32 %v4894_v52, %v4286_v51  ;;  %2066 = vmatpush.bf16.msrb.mxu1 %v4031_v56  ;;  %438 = vst [vmem:[#allocation1 + $0x20] ss:$4 sm:$0xff] %v433_v53 }
  0x74   : > { %v4014_v58 = vld [vmem:[%s5599_s3 + $0x5a0] sm:$0xf]  ;;  %v4826_v59 = vld [vmem:[%s5599_s3 + $0x5ac] sm:$0xf0]  ;;  %v3887_v2 = vor.u32 %v4794_v55, %v3886_v54  ;;  %2079 = vmatpush.bf16.msrb.mxu2 %v4159_v57  ;;  %v4760_v53 = vld [vmem:[%s5599_s3 + $0x3a4] sm:$0xf] }
  0x75   : > { %v432_v60 = vld [vmem:[%s5592_s24] sm:$0xff]  ;;  %v4015_v4 = vor.u32 %v4826_v59, %v4014_v58  ;;  %2092 = vmatpush.bf16.msrb.mxu3 %v4287_v61 }
  0x76   : > { %v4142_v62 = vld [vmem:[%s5599_s3 + $0x6a0] sm:$0xf]  ;;  %v4858_v63 = vld [vmem:[%s5599_s3 + $0x6ac] sm:$0xf0]  ;;  %436 = vst [vmem:[#allocation1] ss:$4 sm:$0xff] %v432_v60  ;;  %2054 = vmatpush.bf16.msrb.mxu0 %v3887_v2 }
  0x77   : > { %v4270_v0 = vld [vmem:[%s5599_s3 + $0x7a0] sm:$0xf]  ;;  %v4890_v1 = vld [vmem:[%s5599_s3 + $0x7ac] sm:$0xf0]  ;;  %v4143_v5 = vor.u32 %v4858_v63, %v4142_v62  ;;  %2067 = vmatpush.bf16.msrb.mxu1 %v4015_v4 }
  0x78   : > { %v3870_v3 = vld [vmem:[%s5599_s3 + $0x480] sm:$0xf]  ;;  %v4790_v6 = vld [vmem:[%s5599_s3 + $0x48c] sm:$0xf0]  ;;  %v4271_v9 = vor.u32 %v4890_v1, %v4270_v0 }
  0x79   : > { %v3998_v7 = vld [vmem:[%s5599_s3 + $0x580] sm:$0xf]  ;;  %v4822_v8 = vld [vmem:[%s5599_s3 + $0x58c] sm:$0xf0]  ;;  %v3871_v16 = vor.u32 %v4790_v6, %v3870_v3  ;;  %2080 = vmatpush.bf16.msrb.mxu2 %v4143_v5 }
  0x7a   : > { %v4126_v10 = vld [vmem:[%s5599_s3 + $0x680] sm:$0xf]  ;;  %v4854_v11 = vld [vmem:[%s5599_s3 + $0x68c] sm:$0xf0]  ;;  %v3999_v21 = vor.u32 %v4822_v8, %v3998_v7  ;;  %2093 = vmatpush.bf16.msrb.mxu3 %v4271_v9  ;;  %v4672_v7 = vld [vmem:[%s5599_s3 + $0xe4] sm:$0xf] }
  0x7b   : > { %v4254_v12 = vld [vmem:[%s5599_s3 + $0x780] sm:$0xf]  ;;  %v4886_v13 = vld [vmem:[%s5599_s3 + $0x78c] sm:$0xf0]  ;;  %v4127_v22 = vor.u32 %v4854_v11, %v4126_v10  ;;  %2055 = vmatpush.bf16.msrb.mxu0 %v3871_v16  ;;  %v3408_v8 = vld [vmem:[%s5599_s3 + $0xf0] sm:$0xf0] }
  0x7c   : > { %v3854_v14 = vld [vmem:[%s5599_s3 + $0x460] sm:$0xf]  ;;  %v4786_v15 = vld [vmem:[%s5599_s3 + $0x46c] sm:$0xf0]  ;;  %v4255_v25 = vor.u32 %v4886_v13, %v4254_v12  ;;  %2068 = vmatpush.bf16.msrb.mxu1 %v3999_v21  ;;  %v4704_v9 = vld [vmem:[%s5599_s3 + $0x1e4] sm:$0xf] }
  0x7d   : > { %v3982_v17 = vld [vmem:[%s5599_s3 + $0x560] sm:$0xf]  ;;  %v4818_v18 = vld [vmem:[%s5599_s3 + $0x56c] sm:$0xf0]  ;;  %v3855_v34 = vor.u32 %v4786_v15, %v3854_v14  ;;  %2081 = vmatpush.bf16.msrb.mxu2 %v4127_v22  ;;  %v3536_v10 = vld [vmem:[%s5599_s3 + $0x1f0] sm:$0xf0]  ;;  %v3411_v22 = vor.u32 %v4672_v7, %v3408_v8 }
  0x7e   : > { %v4110_v19 = vld [vmem:[%s5599_s3 + $0x660] sm:$0xf]  ;;  %v4850_v20 = vld [vmem:[%s5599_s3 + $0x66c] sm:$0xf0]  ;;  %v3983_v35 = vor.u32 %v4818_v18, %v3982_v17  ;;  %2094 = vmatpush.bf16.msrb.mxu3 %v4255_v25  ;;  %v4736_v11 = vld [vmem:[%s5599_s3 + $0x2e4] sm:$0xf]  ;;  %v3539_v25 = vor.u32 %v4704_v9, %v3536_v10 }
  0x7f   : > { %v441_v23 = vld.sshfl [vmem:[#allocation1 + $0x10] sm:$0xff pattern:$0x73625140]  ;;  %v439_v24 = vld.sshfl [vmem:[#allocation1] sm:$0xff pattern:$0x73625140]  ;;  %v4111_v36 = vor.u32 %v4850_v20, %v4110_v19  ;;  %2056 = vmatpush.bf16.msrb.mxu0 %v3855_v34 }
  0x80   : > { %v5721_v26 = vpack.c.bf16 %v441_v23, %v441_v23  ;;  %v5723_v27 = vpack.c.bf16 %v439_v24, %v439_v24  ;;  %v442_v28 = vld.sshfl [vmem:[#allocation1 + $0x18] sm:$0xff pattern:$0x73625140]  ;;  %v440_v29 = vld.sshfl [vmem:[#allocation1 + $0x8] sm:$0xff pattern:$0x73625140]  ;;  %2069 = vmatpush.bf16.msrb.mxu1 %v3983_v35 }
  0x81   : > { %v4238_v30 = vld [vmem:[%s5599_s3 + $0x760] sm:$0xf]  ;;  %v4882_v31 = vld [vmem:[%s5599_s3 + $0x76c] sm:$0xf0]  ;;  %v5727_v32 = vpack.c.bf16 %v442_v28, %v442_v28  ;;  %v5729_v33 = vpack.c.bf16 %v440_v29, %v440_v29  ;;  %2082 = vmatpush.bf16.msrb.mxu2 %v4111_v36  ;;  %v3664_v13 = vld [vmem:[%s5599_s3 + $0x2f0] sm:$0xf0] }
  0x82   : > { %2034 = vmatmul.bf16.vlgmr.msra.gmra.mxu2 %v5721_v26  ;;  %v3838_v37 = vld [vmem:[%s5599_s3 + $0x440] sm:$0xf]  ;;  %v4782_v38 = vld [vmem:[%s5599_s3 + $0x44c] sm:$0xf0]  ;;  %v4239_v40 = vor.u32 %v4882_v31, %v4238_v30  ;;  %2008 = vmatmul.bf16.vlgmr.msra.gmra.mxu0 %v5723_v27  ;;  %v4768_v14 = vld [vmem:[%s5599_s3 + $0x3e4] sm:$0xf]  ;;  %v3667_v28 = vor.u32 %v4736_v11, %v3664_v13 }
  0x83   : > { %v3966_v39 = vld [vmem:[%s5599_s3 + $0x540] sm:$0xf]  ;;  %v4814_v41 = vld [vmem:[%s5599_s3 + $0x54c] sm:$0xf0]  ;;  %2047 = vmatmul.bf16.vlgmr.msra.gmra.mxu3 %v5727_v32  ;;  %2021 = vmatmul.bf16.vlgmr.msra.gmra.mxu1 %v5729_v33  ;;  %v3839_v46 = vor.u32 %v4782_v38, %v3838_v37  ;;  %v3792_v15 = vld [vmem:[%s5599_s3 + $0x3f0] sm:$0xf0] }
  0x84   : > { %v4094_v42 = vld [vmem:[%s5599_s3 + $0x640] sm:$0xf]  ;;  %v4846_v43 = vld [vmem:[%s5599_s3 + $0x64c] sm:$0xf0]  ;;  %v3967_v49 = vor.u32 %v4814_v41, %v3966_v39  ;;  %2095 = vmatpush.bf16.msrb.mxu3 %v4239_v40  ;;  %v4668_v18 = vld [vmem:[%s5599_s3 + $0xc4] sm:$0xf]  ;;  %v3795_v31 = vor.u32 %v4768_v14, %v3792_v15 }
  0x85   : > { %v4222_v44 = vld [vmem:[%s5599_s3 + $0x740] sm:$0xf]  ;;  %v4878_v45 = vld [vmem:[%s5599_s3 + $0x74c] sm:$0xf0]  ;;  %v4095_v50 = vor.u32 %v4846_v43, %v4094_v42  ;;  %2057 = vmatpush.bf16.msrb.mxu0 %v3839_v46  ;;  %v3392_v19 = vld [vmem:[%s5599_s3 + $0xd0] sm:$0xf0] }
  0x86   : > { %v3822_v47 = vld [vmem:[%s5599_s3 + $0x420] sm:$0xf]  ;;  %v4778_v48 = vld [vmem:[%s5599_s3 + $0x42c] sm:$0xf0]  ;;  %v4223_v54 = vor.u32 %v4878_v45, %v4222_v44  ;;  %2070 = vmatpush.bf16.msrb.mxu1 %v3967_v49  ;;  %v4700_v29 = vld [vmem:[%s5599_s3 + $0x1c4] sm:$0xf]  ;;  %v3395_v42 = vor.u32 %v4668_v18, %v3392_v19 }
  0x87   : > { %v3950_v51 = vld [vmem:[%s5599_s3 + $0x520] sm:$0xf]  ;;  %v4810_v52 = vld [vmem:[%s5599_s3 + $0x52c] sm:$0xf0]  ;;  %v3823_v60 = vor.u32 %v4778_v48, %v3822_v47  ;;  %2083 = vmatpush.bf16.msrb.mxu2 %v4095_v50  ;;  %v3520_v34 = vld [vmem:[%s5599_s3 + $0x1d0] sm:$0xf0] }
  0x88   : > { %v4078_v55 = vld [vmem:[%s5599_s3 + $0x620] sm:$0xf]  ;;  %v4842_v56 = vld [vmem:[%s5599_s3 + $0x62c] sm:$0xf0]  ;;  %v3951_v0 = vor.u32 %v4810_v52, %v3950_v51  ;;  %2096 = vmatpush.bf16.msrb.mxu3 %v4223_v54  ;;  %v4732_v35 = vld [vmem:[%s5599_s3 + $0x2c4] sm:$0xf]  ;;  %v3523_v44 = vor.u32 %v4700_v29, %v3520_v34 }
  0x89   : > { %v4206_v57 = vld [vmem:[%s5599_s3 + $0x720] sm:$0xf]  ;;  %v4874_v58 = vld [vmem:[%s5599_s3 + $0x72c] sm:$0xf0]  ;;  %v4079_v1 = vor.u32 %v4842_v56, %v4078_v55  ;;  %2058 = vmatpush.bf16.msrb.mxu0 %v3823_v60  ;;  %v3648_v36 = vld [vmem:[%s5599_s3 + $0x2d0] sm:$0xf0] }
  0x8a   : > { %v3806_v59 = vld [vmem:[%s5599_s3 + $0x400] sm:$0xf]  ;;  %v4774_v61 = vld [vmem:[%s5599_s3 + $0x40c] sm:$0xf0]  ;;  %v4207_v5 = vor.u32 %v4874_v58, %v4206_v57  ;;  %2071 = vmatpush.bf16.msrb.mxu1 %v3951_v0  ;;  %v4764_v38 = vld [vmem:[%s5599_s3 + $0x3c4] sm:$0xf]  ;;  %v3651_v45 = vor.u32 %v4732_v35, %v3648_v36 }
  0x8b   : > { %v3934_v62 = vld [vmem:[%s5599_s3 + $0x500] sm:$0xf]  ;;  %v4806_v63 = vld [vmem:[%s5599_s3 + $0x50c] sm:$0xf0]  ;;  %v3807_v12 = vor.u32 %v4774_v61, %v3806_v59  ;;  %2084 = vmatpush.bf16.msrb.mxu2 %v4079_v1  ;;  %v3776_v39 = vld [vmem:[%s5599_s3 + $0x3d0] sm:$0xf0] }
  0x8c   : > { %v4062_v2 = vld [vmem:[%s5599_s3 + $0x600] sm:$0xf]  ;;  %v4838_v3 = vld [vmem:[%s5599_s3 + $0x60c] sm:$0xf0]  ;;  %v3935_v16 = vor.u32 %v4806_v63, %v3934_v62  ;;  %2097 = vmatpush.bf16.msrb.mxu3 %v4207_v5  ;;  %v4664_v46 = vld [vmem:[%s5599_s3 + $0xa4] sm:$0xf]  ;;  %v3779_v49 = vor.u32 %v4764_v38, %v3776_v39 }
  0x8d   : > { %v4190_v4 = vld [vmem:[%s5599_s3 + $0x700] sm:$0xf]  ;;  %v4870_v6 = vld [vmem:[%s5599_s3 + $0x70c] sm:$0xf0]  ;;  %v4063_v17 = vor.u32 %v4838_v3, %v4062_v2  ;;  %2059 = vmatpush.bf16.msrb.mxu0 %v3807_v12  ;;  %v3376_v47 = vld [vmem:[%s5599_s3 + $0xb0] sm:$0xf0] }
  0x8e   : > { %v445_v20 = vld.sshfl [vmem:[#allocation1 + $0x30] sm:$0xff pattern:$0x73625140]  ;;  %v4191_v21 = vor.u32 %v4870_v6, %v4190_v4  ;;  %v443_v23 = vld.sshfl [vmem:[#allocation1 + $0x20] sm:$0xff pattern:$0x73625140]  ;;  %2072 = vmatpush.bf16.msrb.mxu1 %v3935_v16  ;;  %v3379_v55 = vor.u32 %v4664_v46, %v3376_v47 }
  0x8f   : > { %v446_v24 = vld.sshfl [vmem:[#allocation1 + $0x38] sm:$0xff pattern:$0x73625140]  ;;  %v444_v30 = vld.sshfl [vmem:[#allocation1 + $0x28] sm:$0xff pattern:$0x73625140]  ;;  %v5774_v37 = vpack.c.bf16 %v445_v20, %v445_v20  ;;  %2085 = vmatpush.bf16.msrb.mxu2 %v4063_v17  ;;  %v5778_v40 = vpack.c.bf16 %v443_v23, %v443_v23 }
  0x90   : > { %v5780_v41 = vpack.c.bf16 %v446_v24, %v446_v24  ;;  %2098 = vmatpush.bf16.msrb.mxu3 %v4191_v21  ;;  %v5782_v43 = vpack.c.bf16 %v444_v30, %v444_v30  ;;  %v4696_v48 = vld [vmem:[%s5599_s3 + $0x1a4] sm:$0xf]  ;;  %v3504_v50 = vld [vmem:[%s5599_s3 + $0x1b0] sm:$0xf0] }
  0x91   : > { %2104 = vmatpush.bf16.msra.mxu0 %v3411_v22  ;;  %v4728_v51 = vld [vmem:[%s5599_s3 + $0x2a4] sm:$0xf]  ;;  %v3632_v52 = vld [vmem:[%s5599_s3 + $0x2b0] sm:$0xf0]  ;;  %v3507_v56 = vor.u32 %v4696_v48, %v3504_v50 }
  0x92   : > { %2117 = vmatpush.bf16.msra.mxu1 %v3539_v25  ;;  %2086 = vmatmul.bf16.vlgmr.msrb.gmra.mxu2 %v5774_v37  ;;  %v3760_v54 = vld [vmem:[%s5599_s3 + $0x3b0] sm:$0xf0]  ;;  %v3635_v57 = vor.u32 %v4728_v51, %v3632_v52  ;;  %v4660_v58 = vld [vmem:[%s5599_s3 + $0x84] sm:$0xf] }
  0x93   : > { %2130 = vmatpush.bf16.msra.mxu2 %v3667_v28  ;;  %2060 = vmatmul.bf16.vlgmr.msrb.gmra.mxu0 %v5778_v40  ;;  %v3360_v59 = vld [vmem:[%s5599_s3 + $0x90] sm:$0xf0]  ;;  %v4692_v60 = vld [vmem:[%s5599_s3 + $0x184] sm:$0xf]  ;;  %v3763_v61 = vor.u32 %v4760_v53, %v3760_v54 }
  0x94   : > { %2143 = vmatpush.bf16.msra.mxu3 %v3795_v31  ;;  %2073 = vmatmul.bf16.vlgmr.msrb.gmra.mxu1 %v5782_v43  ;;  %v3488_v62 = vld [vmem:[%s5599_s3 + $0x190] sm:$0xf0]  ;;  %v4724_v63 = vld [vmem:[%s5599_s3 + $0x284] sm:$0xf]  ;;  %v3363_v3 = vor.u32 %v4660_v58, %v3360_v59 }
  0x95   : > { %2099 = vmatmul.bf16.vlgmr.msrb.gmra.mxu3 %v5780_v41  ;;  %2105 = vmatpush.bf16.msra.mxu0 %v3395_v42  ;;  %v3616_v0 = vld [vmem:[%s5599_s3 + $0x290] sm:$0xf0]  ;;  %v4756_v1 = vld [vmem:[%s5599_s3 + $0x384] sm:$0xf]  ;;  %v3491_v4 = vor.u32 %v4692_v60, %v3488_v62 }
  0x96   : > { %2118 = vmatpush.bf16.msra.mxu1 %v3523_v44  ;;  %v3744_v2 = vld [vmem:[%s5599_s3 + $0x390] sm:$0xf0]  ;;  %v3619_v5 = vor.u32 %v4724_v63, %v3616_v0  ;;  %v4656_v6 = vld [vmem:[%s5599_s3 + $0x64] sm:$0xf] }
  0x97   : > { %2131 = vmatpush.bf16.msra.mxu2 %v3651_v45  ;;  %v3344_v7 = vld [vmem:[%s5599_s3 + $0x70] sm:$0xf0]  ;;  %v4688_v8 = vld [vmem:[%s5599_s3 + $0x164] sm:$0xf]  ;;  %v3747_v9 = vor.u32 %v4756_v1, %v3744_v2 }
  0x98   : > { %2144 = vmatpush.bf16.msra.mxu3 %v3779_v49  ;;  %v3472_v10 = vld [vmem:[%s5599_s3 + $0x170] sm:$0xf0]  ;;  %v4720_v11 = vld [vmem:[%s5599_s3 + $0x264] sm:$0xf]  ;;  %v3347_v15 = vor.u32 %v4656_v6, %v3344_v7 }
  0x99   : > { %2106 = vmatpush.bf16.msra.mxu0 %v3379_v55  ;;  %v3600_v12 = vld [vmem:[%s5599_s3 + $0x270] sm:$0xf0]  ;;  %v4752_v13 = vld [vmem:[%s5599_s3 + $0x364] sm:$0xf]  ;;  %v3475_v16 = vor.u32 %v4688_v8, %v3472_v10 }
  0x9a   : > { %2119 = vmatpush.bf16.msra.mxu1 %v3507_v56  ;;  %v3728_v14 = vld [vmem:[%s5599_s3 + $0x370] sm:$0xf0]  ;;  %v3603_v17 = vor.u32 %v4720_v11, %v3600_v12  ;;  %v4652_v18 = vld [vmem:[%s5599_s3 + $0x44] sm:$0xf] }
  0x9b   : > { %2132 = vmatpush.bf16.msra.mxu2 %v3635_v57  ;;  %v3328_v19 = vld [vmem:[%s5599_s3 + $0x50] sm:$0xf0]  ;;  %v4684_v20 = vld [vmem:[%s5599_s3 + $0x144] sm:$0xf]  ;;  %v3731_v21 = vor.u32 %v4752_v13, %v3728_v14 }
  0x9c   : > { %2145 = vmatpush.bf16.msra.mxu3 %v3763_v61  ;;  %v3456_v22 = vld [vmem:[%s5599_s3 + $0x150] sm:$0xf0]  ;;  %v4716_v23 = vld [vmem:[%s5599_s3 + $0x244] sm:$0xf]  ;;  %v3331_v29 = vor.u32 %v4652_v18, %v3328_v19 }
  0x9d   : > { %2107 = vmatpush.bf16.msra.mxu0 %v3363_v3  ;;  %v3584_v24 = vld [vmem:[%s5599_s3 + $0x250] sm:$0xf0]  ;;  %v4748_v25 = vld [vmem:[%s5599_s3 + $0x344] sm:$0xf]  ;;  %v3459_v30 = vor.u32 %v4684_v20, %v3456_v22 }
  0x9e   : > { %2120 = vmatpush.bf16.msra.mxu1 %v3491_v4  ;;  %v3712_v28 = vld [vmem:[%s5599_s3 + $0x350] sm:$0xf0]  ;;  %v3587_v31 = vor.u32 %v4716_v23, %v3584_v24  ;;  %v4648_v34 = vld [vmem:[%s5599_s3 + $0x24] sm:$0xf] }
  0x9f   : > { %2133 = vmatpush.bf16.msra.mxu2 %v3619_v5  ;;  %v3312_v35 = vld [vmem:[%s5599_s3 + $0x30] sm:$0xf0]  ;;  %v4680_v36 = vld [vmem:[%s5599_s3 + $0x124] sm:$0xf]  ;;  %v3715_v38 = vor.u32 %v4748_v25, %v3712_v28 }
  0xa0   : > { %2146 = vmatpush.bf16.msra.mxu3 %v3747_v9  ;;  %v3440_v39 = vld [vmem:[%s5599_s3 + $0x130] sm:$0xf0]  ;;  %v4712_v42 = vld [vmem:[%s5599_s3 + $0x224] sm:$0xf]  ;;  %v3315_v47 = vor.u32 %v4648_v34, %v3312_v35 }
  0xa1   : > { %2108 = vmatpush.bf16.msra.mxu0 %v3347_v15  ;;  %v3568_v44 = vld [vmem:[%s5599_s3 + $0x230] sm:$0xf0]  ;;  %v4744_v45 = vld [vmem:[%s5599_s3 + $0x324] sm:$0xf]  ;;  %v3443_v50 = vor.u32 %v4680_v36, %v3440_v39 }
  0xa2   : > { %2121 = vmatpush.bf16.msra.mxu1 %v3475_v16  ;;  %v3696_v46 = vld [vmem:[%s5599_s3 + $0x330] sm:$0xf0]  ;;  %v4644_v48 = vld [vmem:[%s5599_s3 + $0x4] sm:$0xf]  ;;  %v3571_v51 = vor.u32 %v4712_v42, %v3568_v44 }
  0xa3   : > { %2134 = vmatpush.bf16.msra.mxu2 %v3603_v17  ;;  %v3296_v49 = vld [vmem:[%s5599_s3 + $0x10] sm:$0xf0]  ;;  %v4676_v52 = vld [vmem:[%s5599_s3 + $0x104] sm:$0xf]  ;;  %v3699_v55 = vor.u32 %v4744_v45, %v3696_v46 }
  0xa4   : > { %2147 = vmatpush.bf16.msra.mxu3 %v3731_v21  ;;  %v3424_v53 = vld [vmem:[%s5599_s3 + $0x110] sm:$0xf0]  ;;  %v4708_v54 = vld [vmem:[%s5599_s3 + $0x204] sm:$0xf]  ;;  %v3299_v62 = vor.u32 %v4644_v48, %v3296_v49 }
  0xa5   : > { %2109 = vmatpush.bf16.msra.mxu0 %v3331_v29  ;;  %v3552_v56 = vld [vmem:[%s5599_s3 + $0x210] sm:$0xf0]  ;;  %v4740_v57 = vld [vmem:[%s5599_s3 + $0x304] sm:$0xf]  ;;  %v3427_v2 = vor.u32 %v4676_v52, %v3424_v53 }
  0xa6   : > { %2122 = vmatpush.bf16.msra.mxu1 %v3459_v30  ;;  %v3680_v58 = vld [vmem:[%s5599_s3 + $0x310] sm:$0xf0]  ;;  %v4800_v59 = vld [vmem:[%s5599_s3 + $0x4e4] sm:$0xf]  ;;  %v3555_v3 = vor.u32 %v4708_v54, %v3552_v56 }
  0xa7   : > { %2135 = vmatpush.bf16.msra.mxu2 %v3587_v31  ;;  %v3920_v60 = vld [vmem:[%s5599_s3 + $0x4f0] sm:$0xf0]  ;;  %v4832_v61 = vld [vmem:[%s5599_s3 + $0x5e4] sm:$0xf]  ;;  %v3683_v6 = vor.u32 %v4740_v57, %v3680_v58 }
  0xa8   : > { %2148 = vmatpush.bf16.msra.mxu3 %v3715_v38  ;;  %v4048_v63 = vld [vmem:[%s5599_s3 + $0x5f0] sm:$0xf0]  ;;  %v4864_v0 = vld [vmem:[%s5599_s3 + $0x6e4] sm:$0xf]  ;;  %v3923_v7 = vor.u32 %v4800_v59, %v3920_v60 }
  0xa9   : > { %2110 = vmatpush.bf16.msra.mxu0 %v3315_v47  ;;  %v4176_v1 = vld [vmem:[%s5599_s3 + $0x6f0] sm:$0xf0]  ;;  %v4896_v4 = vld [vmem:[%s5599_s3 + $0x7e4] sm:$0xf]  ;;  %v4051_v8 = vor.u32 %v4832_v61, %v4048_v63 }
  0xaa   : > { %2123 = vmatpush.bf16.msra.mxu1 %v3443_v50  ;;  %v4304_v5 = vld [vmem:[%s5599_s3 + $0x7f0] sm:$0xf0]  ;;  %v4179_v9 = vor.u32 %v4864_v0, %v4176_v1  ;;  %v4796_v10 = vld [vmem:[%s5599_s3 + $0x4c4] sm:$0xf] }
  0xab   : > { %2136 = vmatpush.bf16.msra.mxu2 %v3571_v51  ;;  %v3904_v11 = vld [vmem:[%s5599_s3 + $0x4d0] sm:$0xf0]  ;;  %v4828_v12 = vld [vmem:[%s5599_s3 + $0x5c4] sm:$0xf]  ;;  %v4307_v13 = vor.u32 %v4896_v4, %v4304_v5 }
  0xac   : > { %2149 = vmatpush.bf16.msra.mxu3 %v3699_v55  ;;  %v4032_v14 = vld [vmem:[%s5599_s3 + $0x5d0] sm:$0xf0]  ;;  %v4860_v15 = vld [vmem:[%s5599_s3 + $0x6c4] sm:$0xf]  ;;  %v3907_v19 = vor.u32 %v4796_v10, %v3904_v11 }
  0xad   : > { %2111 = vmatpush.bf16.msra.mxu0 %v3299_v62  ;;  %v4160_v16 = vld [vmem:[%s5599_s3 + $0x6d0] sm:$0xf0]  ;;  %v4892_v17 = vld [vmem:[%s5599_s3 + $0x7c4] sm:$0xf]  ;;  %v4035_v20 = vor.u32 %v4828_v12, %v4032_v14 }
  0xae   : > { %2124 = vmatpush.bf16.msra.mxu1 %v3427_v2  ;;  %v4288_v18 = vld [vmem:[%s5599_s3 + $0x7d0] sm:$0xf0]  ;;  %v4163_v21 = vor.u32 %v4860_v15, %v4160_v16  ;;  %v4792_v22 = vld [vmem:[%s5599_s3 + $0x4a4] sm:$0xf] }
  0xaf   : > { %2137 = vmatpush.bf16.msra.mxu2 %v3555_v3  ;;  %v3888_v23 = vld [vmem:[%s5599_s3 + $0x4b0] sm:$0xf0]  ;;  %v4824_v24 = vld [vmem:[%s5599_s3 + $0x5a4] sm:$0xf]  ;;  %v4291_v25 = vor.u32 %v4892_v17, %v4288_v18 }
  0xb0   : > { %2150 = vmatpush.bf16.msra.mxu3 %v3683_v6  ;;  %v4016_v28 = vld [vmem:[%s5599_s3 + $0x5b0] sm:$0xf0]  ;;  %v4856_v29 = vld [vmem:[%s5599_s3 + $0x6a4] sm:$0xf]  ;;  %2112 = vmatmul.bf16.vlgmr.msra.gmra.mxu0 %v5723_v27  ;;  %v3891_v35 = vor.u32 %v4792_v22, %v3888_v23 }
  0xb1   : > { %2156 = vmatpush.bf16.msrb.mxu0 %v3923_v7  ;;  %v4144_v30 = vld [vmem:[%s5599_s3 + $0x6b0] sm:$0xf0]  ;;  %v4888_v31 = vld [vmem:[%s5599_s3 + $0x7a4] sm:$0xf]  ;;  %2125 = vmatmul.bf16.vlgmr.msra.gmra.mxu1 %v5729_v33  ;;  %v4019_v36 = vor.u32 %v4824_v24, %v4016_v28 }
  0xb2   : > { %2169 = vmatpush.bf16.msrb.mxu1 %v4051_v8  ;;  %2138 = vmatmul.bf16.vlgmr.msra.gmra.mxu2 %v5721_v26  ;;  %v4272_v34 = vld [vmem:[%s5599_s3 + $0x7b0] sm:$0xf0]  ;;  %v4147_v38 = vor.u32 %v4856_v29, %v4144_v30  ;;  %v4788_v39 = vld [vmem:[%s5599_s3 + $0x484] sm:$0xf] }
  0xb3   : > { %2182 = vmatpush.bf16.msrb.mxu2 %v4179_v9  ;;  %2151 = vmatmul.bf16.vlgmr.msra.gmra.mxu3 %v5727_v32  ;;  %v3872_v42 = vld [vmem:[%s5599_s3 + $0x490] sm:$0xf0]  ;;  %v4820_v44 = vld [vmem:[%s5599_s3 + $0x584] sm:$0xf]  ;;  %v4275_v45 = vor.u32 %v4888_v31, %v4272_v34 }
  0xb4   : > { %2195 = vmatpush.bf16.msrb.mxu3 %v4307_v13  ;;  %v4000_v46 = vld [vmem:[%s5599_s3 + $0x590] sm:$0xf0]  ;;  %v4852_v47 = vld [vmem:[%s5599_s3 + $0x684] sm:$0xf]  ;;  %v3875_v51 = vor.u32 %v4788_v39, %v3872_v42  ;;  %v3414_v42 = vld [vmem:[%s5599_s3 + $0xe8] sm:$0xf] }
  0xb5   : > { %2157 = vmatpush.bf16.msrb.mxu0 %v3907_v19  ;;  %v4128_v48 = vld [vmem:[%s5599_s3 + $0x690] sm:$0xf0]  ;;  %v4884_v49 = vld [vmem:[%s5599_s3 + $0x784] sm:$0xf]  ;;  %v4003_v52 = vor.u32 %v4820_v44, %v4000_v46  ;;  %v4675_v44 = vld [vmem:[%s5599_s3 + $0xf4] sm:$0xf0] }
  0xb6   : > { %2170 = vmatpush.bf16.msrb.mxu1 %v4035_v20  ;;  %v4256_v50 = vld [vmem:[%s5599_s3 + $0x790] sm:$0xf0]  ;;  %v4131_v53 = vor.u32 %v4852_v47, %v4128_v48  ;;  %v4784_v54 = vld [vmem:[%s5599_s3 + $0x464] sm:$0xf]  ;;  %v4707_v47 = vld [vmem:[%s5599_s3 + $0x1f4] sm:$0xf0] }
  0xb7   : > { %2183 = vmatpush.bf16.msrb.mxu2 %v4163_v21  ;;  %v3856_v55 = vld [vmem:[%s5599_s3 + $0x470] sm:$0xf0]  ;;  %v4816_v56 = vld [vmem:[%s5599_s3 + $0x564] sm:$0xf]  ;;  %v4259_v57 = vor.u32 %v4884_v49, %v4256_v50  ;;  %v3670_v48 = vld [vmem:[%s5599_s3 + $0x2e8] sm:$0xf] }
  0xb8   : > { %2196 = vmatpush.bf16.msrb.mxu3 %v4291_v25  ;;  %v3984_v58 = vld [vmem:[%s5599_s3 + $0x570] sm:$0xf0]  ;;  %v4848_v59 = vld [vmem:[%s5599_s3 + $0x664] sm:$0xf]  ;;  %v3859_v63 = vor.u32 %v4784_v54, %v3856_v55  ;;  %v4739_v49 = vld [vmem:[%s5599_s3 + $0x2f4] sm:$0xf0]  ;;  %v3415_v55 = vor.u32 %v4675_v44, %v3414_v42 }
  0xb9   : > { %2158 = vmatpush.bf16.msrb.mxu0 %v3891_v35  ;;  %v4112_v60 = vld [vmem:[%s5599_s3 + $0x670] sm:$0xf0]  ;;  %v4880_v61 = vld [vmem:[%s5599_s3 + $0x764] sm:$0xf]  ;;  %v3987_v0 = vor.u32 %v4816_v56, %v3984_v58  ;;  %v3398_v58 = vld [vmem:[%s5599_s3 + $0xc8] sm:$0xf] }
  0xba   : > { %2171 = vmatpush.bf16.msrb.mxu1 %v4019_v36  ;;  %v4240_v62 = vld [vmem:[%s5599_s3 + $0x770] sm:$0xf0]  ;;  %v4115_v1 = vor.u32 %v4848_v59, %v4112_v60  ;;  %v4780_v2 = vld [vmem:[%s5599_s3 + $0x444] sm:$0xf]  ;;  %v4671_v59 = vld [vmem:[%s5599_s3 + $0xd4] sm:$0xf0] }
  0xbb   : > { %2184 = vmatpush.bf16.msrb.mxu2 %v4147_v38  ;;  %v3840_v3 = vld [vmem:[%s5599_s3 + $0x450] sm:$0xf0]  ;;  %v4812_v4 = vld [vmem:[%s5599_s3 + $0x544] sm:$0xf]  ;;  %v4243_v5 = vor.u32 %v4880_v61, %v4240_v62  ;;  %v3526_v60 = vld [vmem:[%s5599_s3 + $0x1c8] sm:$0xf] }
  0xbc   : > { %2197 = vmatpush.bf16.msrb.mxu3 %v4275_v45  ;;  %v3968_v6 = vld [vmem:[%s5599_s3 + $0x550] sm:$0xf0]  ;;  %v4844_v7 = vld [vmem:[%s5599_s3 + $0x644] sm:$0xf]  ;;  %v3843_v11 = vor.u32 %v4780_v2, %v3840_v3  ;;  %v3542_v45 = vld [vmem:[%s5599_s3 + $0x1e8] sm:$0xf]  ;;  %v3399_v3 = vor.u32 %v4671_v59, %v3398_v58 }
  0xbd   : > { %2159 = vmatpush.bf16.msrb.mxu0 %v3875_v51  ;;  %v4096_v8 = vld [vmem:[%s5599_s3 + $0x650] sm:$0xf0]  ;;  %v4876_v9 = vld [vmem:[%s5599_s3 + $0x744] sm:$0xf]  ;;  %v3971_v12 = vor.u32 %v4812_v4, %v3968_v6  ;;  %v3543_v56 = vor.u32 %v4707_v47, %v3542_v45  ;;  %v4703_v62 = vld [vmem:[%s5599_s3 + $0x1d4] sm:$0xf0] }
  0xbe   : > { %2172 = vmatpush.bf16.msrb.mxu1 %v4003_v52  ;;  %v4224_v10 = vld [vmem:[%s5599_s3 + $0x750] sm:$0xf0]  ;;  %v4099_v13 = vor.u32 %v4844_v7, %v4096_v8  ;;  %v4776_v14 = vld [vmem:[%s5599_s3 + $0x424] sm:$0xf]  ;;  %v3798_v52 = vld [vmem:[%s5599_s3 + $0x3e8] sm:$0xf]  ;;  %v3527_v4 = vor.u32 %v4703_v62, %v3526_v60 }
  0xbf   : > { %2185 = vmatpush.bf16.msrb.mxu2 %v4131_v53  ;;  %v3824_v15 = vld [vmem:[%s5599_s3 + $0x430] sm:$0xf0]  ;;  %v4808_v16 = vld [vmem:[%s5599_s3 + $0x524] sm:$0xf]  ;;  %v4227_v17 = vor.u32 %v4876_v9, %v4224_v10  ;;  %v4771_v53 = vld [vmem:[%s5599_s3 + $0x3f4] sm:$0xf0] }
  0xc0   : > { %2198 = vmatpush.bf16.msrb.mxu3 %v4259_v57  ;;  %v3952_v18 = vld [vmem:[%s5599_s3 + $0x530] sm:$0xf0]  ;;  %v4840_v19 = vld [vmem:[%s5599_s3 + $0x624] sm:$0xf]  ;;  %v3827_v23 = vor.u32 %v4776_v14, %v3824_v15  ;;  %v3671_v57 = vor.u32 %v4739_v49, %v3670_v48  ;;  %v3799_v61 = vor.u32 %v4771_v53, %v3798_v52  ;;  %v4767_v2 = vld [vmem:[%s5599_s3 + $0x3d4] sm:$0xf0] }
  0xc1   : > { %2160 = vmatpush.bf16.msrb.mxu0 %v3859_v63  ;;  %v4080_v20 = vld [vmem:[%s5599_s3 + $0x630] sm:$0xf0]  ;;  %v4872_v21 = vld [vmem:[%s5599_s3 + $0x724] sm:$0xf]  ;;  %v3955_v28 = vor.u32 %v4808_v16, %v3952_v18  ;;  %v3654_v63 = vld [vmem:[%s5599_s3 + $0x2c8] sm:$0xf] }
  0xc2   : > { %2173 = vmatpush.bf16.msrb.mxu1 %v3987_v0  ;;  %v4208_v22 = vld [vmem:[%s5599_s3 + $0x730] sm:$0xf0]  ;;  %v4772_v24 = vld [vmem:[%s5599_s3 + $0x404] sm:$0xf]  ;;  %v4083_v29 = vor.u32 %v4840_v19, %v4080_v20  ;;  %v4735_v0 = vld [vmem:[%s5599_s3 + $0x2d4] sm:$0xf0] }
  0xc3   : > { %2186 = vmatpush.bf16.msrb.mxu2 %v4115_v1  ;;  %v3808_v25 = vld [vmem:[%s5599_s3 + $0x410] sm:$0xf0]  ;;  %v4804_v30 = vld [vmem:[%s5599_s3 + $0x504] sm:$0xf]  ;;  %v4211_v35 = vor.u32 %v4872_v21, %v4208_v22  ;;  %v3782_v1 = vld [vmem:[%s5599_s3 + $0x3c8] sm:$0xf] }
  0xc4   : > { %2199 = vmatpush.bf16.msrb.mxu3 %v4243_v5  ;;  %v3936_v31 = vld [vmem:[%s5599_s3 + $0x510] sm:$0xf0]  ;;  %v4836_v34 = vld [vmem:[%s5599_s3 + $0x604] sm:$0xf]  ;;  %v3811_v46 = vor.u32 %v4772_v24, %v3808_v25  ;;  %v3655_v5 = vor.u32 %v4735_v0, %v3654_v63  ;;  %v3382_v6 = vld [vmem:[%s5599_s3 + $0xa8] sm:$0xf]  ;;  %v3783_v9 = vor.u32 %v4767_v2, %v3782_v1 }
  0xc5   : > { %2161 = vmatpush.bf16.msrb.mxu0 %v3843_v11  ;;  %v4064_v36 = vld [vmem:[%s5599_s3 + $0x610] sm:$0xf0]  ;;  %v4868_v38 = vld [vmem:[%s5599_s3 + $0x704] sm:$0xf]  ;;  %v3939_v50 = vor.u32 %v4804_v30, %v3936_v31  ;;  %v4667_v7 = vld [vmem:[%s5599_s3 + $0xb4] sm:$0xf0] }
  0xc6   : > { %2174 = vmatpush.bf16.msrb.mxu1 %v3971_v12  ;;  %v4192_v39 = vld [vmem:[%s5599_s3 + $0x710] sm:$0xf0]  ;;  %v4067_v51 = vor.u32 %v4836_v34, %v4064_v36  ;;  %v3510_v8 = vld [vmem:[%s5599_s3 + $0x1a8] sm:$0xf]  ;;  %v4699_v10 = vld [vmem:[%s5599_s3 + $0x1b4] sm:$0xf0]  ;;  %v3383_v15 = vor.u32 %v4667_v7, %v3382_v6 }
  0xc7   : > { %2187 = vmatpush.bf16.msrb.mxu2 %v4099_v13  ;;  %v4195_v54 = vor.u32 %v4868_v38, %v4192_v39  ;;  %v3638_v11 = vld [vmem:[%s5599_s3 + $0x2a8] sm:$0xf]  ;;  %v4731_v12 = vld [vmem:[%s5599_s3 + $0x2b4] sm:$0xf0]  ;;  %v3511_v16 = vor.u32 %v4699_v10, %v3510_v8 }
  0xc8   : > { %2200 = vmatpush.bf16.msrb.mxu3 %v4227_v17  ;;  %v3766_v13 = vld [vmem:[%s5599_s3 + $0x3a8] sm:$0xf]  ;;  %v4763_v14 = vld [vmem:[%s5599_s3 + $0x3b4] sm:$0xf0]  ;;  %v3639_v17 = vor.u32 %v4731_v12, %v3638_v11 }
  0xc9   : > { %2162 = vmatpush.bf16.msrb.mxu0 %v3827_v23  ;;  %v3366_v18 = vld [vmem:[%s5599_s3 + $0x88] sm:$0xf]  ;;  %v4663_v19 = vld [vmem:[%s5599_s3 + $0x94] sm:$0xf0]  ;;  %v3767_v21 = vor.u32 %v4763_v14, %v3766_v13 }
  0xca   : > { %2175 = vmatpush.bf16.msrb.mxu1 %v3955_v28  ;;  %v3494_v20 = vld [vmem:[%s5599_s3 + $0x188] sm:$0xf]  ;;  %v4695_v22 = vld [vmem:[%s5599_s3 + $0x194] sm:$0xf0] }
  0xcb   : > { %2188 = vmatpush.bf16.msrb.mxu2 %v4083_v29  ;;  %v3622_v23 = vld [vmem:[%s5599_s3 + $0x288] sm:$0xf]  ;;  %v4727_v24 = vld [vmem:[%s5599_s3 + $0x294] sm:$0xf0]  ;;  %v3367_v29 = vor.u32 %v4663_v19, %v3366_v18  ;;  %v3495_v30 = vor.u32 %v4695_v22, %v3494_v20 }
  0xcc   : > { %2201 = vmatpush.bf16.msrb.mxu3 %v4211_v35  ;;  %v3750_v25 = vld [vmem:[%s5599_s3 + $0x388] sm:$0xf]  ;;  %v4759_v28 = vld [vmem:[%s5599_s3 + $0x394] sm:$0xf0]  ;;  %v3623_v31 = vor.u32 %v4727_v24, %v3622_v23 }
  0xcd   : > { %2163 = vmatpush.bf16.msrb.mxu0 %v3811_v46  ;;  %v3350_v34 = vld [vmem:[%s5599_s3 + $0x68] sm:$0xf]  ;;  %v4659_v35 = vld [vmem:[%s5599_s3 + $0x74] sm:$0xf0]  ;;  %v3751_v38 = vor.u32 %v4759_v28, %v3750_v25 }
  0xce   : > { %2176 = vmatpush.bf16.msrb.mxu1 %v3939_v50  ;;  %v3478_v36 = vld [vmem:[%s5599_s3 + $0x168] sm:$0xf]  ;;  %v4691_v39 = vld [vmem:[%s5599_s3 + $0x174] sm:$0xf0]  ;;  %v3351_v47 = vor.u32 %v4659_v35, %v3350_v34 }
  0xcf   : > { %2189 = vmatpush.bf16.msrb.mxu2 %v4067_v51  ;;  %v3606_v42 = vld [vmem:[%s5599_s3 + $0x268] sm:$0xf]  ;;  %v4723_v44 = vld [vmem:[%s5599_s3 + $0x274] sm:$0xf0]  ;;  %v3479_v48 = vor.u32 %v4691_v39, %v3478_v36 }
  0xd0   : > { %2202 = vmatpush.bf16.msrb.mxu3 %v4195_v54  ;;  %2164 = vmatmul.bf16.vlgmr.msrb.gmra.mxu0 %v5778_v40  ;;  %v3734_v45 = vld [vmem:[%s5599_s3 + $0x368] sm:$0xf]  ;;  %v4755_v46 = vld [vmem:[%s5599_s3 + $0x374] sm:$0xf0]  ;;  %v3607_v49 = vor.u32 %v4723_v44, %v3606_v42 }
  0xd1   : > { %2208 = vmatpush.bf16.msra.mxu0 %v3415_v55  ;;  %2177 = vmatmul.bf16.vlgmr.msrb.gmra.mxu1 %v5782_v43  ;;  %v3334_v50 = vld [vmem:[%s5599_s3 + $0x48] sm:$0xf]  ;;  %v4655_v51 = vld [vmem:[%s5599_s3 + $0x54] sm:$0xf0]  ;;  %v3735_v53 = vor.u32 %v4755_v46, %v3734_v45 }
  0xd2   : > { %2221 = vmatpush.bf16.msra.mxu1 %v3543_v56  ;;  %2190 = vmatmul.bf16.vlgmr.msrb.gmra.mxu2 %v5774_v37  ;;  %v3462_v52 = vld [vmem:[%s5599_s3 + $0x148] sm:$0xf]  ;;  %v4687_v54 = vld [vmem:[%s5599_s3 + $0x154] sm:$0xf0]  ;;  %v3335_v59 = vor.u32 %v4655_v51, %v3334_v50 }
  0xd3   : > { %2234 = vmatpush.bf16.msra.mxu2 %v3671_v57  ;;  %2203 = vmatmul.bf16.vlgmr.msrb.gmra.mxu3 %v5780_v41  ;;  %v3590_v55 = vld [vmem:[%s5599_s3 + $0x248] sm:$0xf]  ;;  %v4719_v56 = vld [vmem:[%s5599_s3 + $0x254] sm:$0xf0]  ;;  %v3463_v60 = vor.u32 %v4687_v54, %v3462_v52 }
  0xd4   : > { %2247 = vmatpush.bf16.msra.mxu3 %v3799_v61  ;;  %v3718_v57 = vld [vmem:[%s5599_s3 + $0x348] sm:$0xf]  ;;  %v4751_v58 = vld [vmem:[%s5599_s3 + $0x354] sm:$0xf0]  ;;  %v3591_v61 = vor.u32 %v4719_v56, %v3590_v55 }
  0xd5   : > { %2209 = vmatpush.bf16.msra.mxu0 %v3399_v3  ;;  %v3318_v62 = vld [vmem:[%s5599_s3 + $0x28] sm:$0xf]  ;;  %v4651_v63 = vld [vmem:[%s5599_s3 + $0x34] sm:$0xf0]  ;;  %v3719_v1 = vor.u32 %v4751_v58, %v3718_v57 }
  0xd6   : > { %2222 = vmatpush.bf16.msra.mxu1 %v3527_v4  ;;  %v3446_v0 = vld [vmem:[%s5599_s3 + $0x128] sm:$0xf]  ;;  %v4683_v2 = vld [vmem:[%s5599_s3 + $0x134] sm:$0xf0]  ;;  %v3319_v7 = vor.u32 %v4651_v63, %v3318_v62 }
  0xd7   : > { %2235 = vmatpush.bf16.msra.mxu2 %v3655_v5  ;;  %v3574_v3 = vld [vmem:[%s5599_s3 + $0x228] sm:$0xf]  ;;  %v4715_v4 = vld [vmem:[%s5599_s3 + $0x234] sm:$0xf0]  ;;  %v3447_v10 = vor.u32 %v4683_v2, %v3446_v0 }
  0xd8   : > { %2248 = vmatpush.bf16.msra.mxu3 %v3783_v9  ;;  %v3702_v5 = vld [vmem:[%s5599_s3 + $0x328] sm:$0xf]  ;;  %v4747_v6 = vld [vmem:[%s5599_s3 + $0x334] sm:$0xf0]  ;;  %v3575_v11 = vor.u32 %v4715_v4, %v3574_v3 }
  0xd9   : > { %2210 = vmatpush.bf16.msra.mxu0 %v3383_v15  ;;  %v3302_v8 = vld [vmem:[%s5599_s3 + $0x8] sm:$0xf]  ;;  %v4647_v9 = vld [vmem:[%s5599_s3 + $0x14] sm:$0xf0]  ;;  %v3703_v15 = vor.u32 %v4747_v6, %v3702_v5 }
  0xda   : > { %2223 = vmatpush.bf16.msra.mxu1 %v3511_v16  ;;  %v3430_v12 = vld [vmem:[%s5599_s3 + $0x108] sm:$0xf]  ;;  %v4679_v13 = vld [vmem:[%s5599_s3 + $0x114] sm:$0xf0]  ;;  %v3303_v22 = vor.u32 %v4647_v9, %v3302_v8 }
  0xdb   : > { %2236 = vmatpush.bf16.msra.mxu2 %v3639_v17  ;;  %v3558_v14 = vld [vmem:[%s5599_s3 + $0x208] sm:$0xf]  ;;  %v4711_v16 = vld [vmem:[%s5599_s3 + $0x214] sm:$0xf0]  ;;  %v3431_v28 = vor.u32 %v4679_v13, %v3430_v12 }
  0xdc   : > { %2249 = vmatpush.bf16.msra.mxu3 %v3767_v21  ;;  %v3686_v17 = vld [vmem:[%s5599_s3 + $0x308] sm:$0xf]  ;;  %v4743_v18 = vld [vmem:[%s5599_s3 + $0x314] sm:$0xf0] }
  0xdd   : > { %2211 = vmatpush.bf16.msra.mxu0 %v3367_v29  ;;  %v3926_v19 = vld [vmem:[%s5599_s3 + $0x4e8] sm:$0xf]  ;;  %v4803_v20 = vld [vmem:[%s5599_s3 + $0x4f4] sm:$0xf0]  ;;  %v3559_v29 = vor.u32 %v4711_v16, %v3558_v14  ;;  %v3687_v34 = vor.u32 %v4743_v18, %v3686_v17 }
  0xde   : > { %2224 = vmatpush.bf16.msra.mxu1 %v3495_v30  ;;  %v4054_v21 = vld [vmem:[%s5599_s3 + $0x5e8] sm:$0xf]  ;;  %v4835_v23 = vld [vmem:[%s5599_s3 + $0x5f4] sm:$0xf0]  ;;  %v3927_v35 = vor.u32 %v4803_v20, %v3926_v19 }
  0xdf   : > { %2237 = vmatpush.bf16.msra.mxu2 %v3623_v31  ;;  %v4182_v24 = vld [vmem:[%s5599_s3 + $0x6e8] sm:$0xf]  ;;  %v4867_v25 = vld [vmem:[%s5599_s3 + $0x6f4] sm:$0xf0]  ;;  %v4055_v36 = vor.u32 %v4835_v23, %v4054_v21 }
  0xe0   : > { %2250 = vmatpush.bf16.msra.mxu3 %v3751_v38  ;;  %v4310_v30 = vld [vmem:[%s5599_s3 + $0x7e8] sm:$0xf]  ;;  %v4899_v31 = vld [vmem:[%s5599_s3 + $0x7f4] sm:$0xf0]  ;;  %v4183_v38 = vor.u32 %v4867_v25, %v4182_v24 }
  0xe1   : > { %2212 = vmatpush.bf16.msra.mxu0 %v3351_v47  ;;  %v3910_v39 = vld [vmem:[%s5599_s3 + $0x4c8] sm:$0xf]  ;;  %v4799_v42 = vld [vmem:[%s5599_s3 + $0x4d4] sm:$0xf0]  ;;  %v4311_v45 = vor.u32 %v4899_v31, %v4310_v30 }
  0xe2   : > { %2225 = vmatpush.bf16.msra.mxu1 %v3479_v48  ;;  %v4038_v44 = vld [vmem:[%s5599_s3 + $0x5c8] sm:$0xf]  ;;  %v4831_v46 = vld [vmem:[%s5599_s3 + $0x5d4] sm:$0xf0]  ;;  %v3911_v51 = vor.u32 %v4799_v42, %v3910_v39 }
  0xe3   : > { %2238 = vmatpush.bf16.msra.mxu2 %v3607_v49  ;;  %v4166_v47 = vld [vmem:[%s5599_s3 + $0x6c8] sm:$0xf]  ;;  %v4863_v48 = vld [vmem:[%s5599_s3 + $0x6d4] sm:$0xf0]  ;;  %v4039_v52 = vor.u32 %v4831_v46, %v4038_v44 }
  0xe4   : > { %2251 = vmatpush.bf16.msra.mxu3 %v3735_v53  ;;  %v4294_v49 = vld [vmem:[%s5599_s3 + $0x7c8] sm:$0xf]  ;;  %v4895_v50 = vld [vmem:[%s5599_s3 + $0x7d4] sm:$0xf0]  ;;  %v4167_v53 = vor.u32 %v4863_v48, %v4166_v47 }
  0xe5   : > { %2213 = vmatpush.bf16.msra.mxu0 %v3335_v59  ;;  %v3894_v54 = vld [vmem:[%s5599_s3 + $0x4a8] sm:$0xf]  ;;  %v4795_v55 = vld [vmem:[%s5599_s3 + $0x4b4] sm:$0xf0]  ;;  %v4295_v57 = vor.u32 %v4895_v50, %v4294_v49 }
  0xe6   : > { %2226 = vmatpush.bf16.msra.mxu1 %v3463_v60  ;;  %v4022_v56 = vld [vmem:[%s5599_s3 + $0x5a8] sm:$0xf]  ;;  %v4827_v58 = vld [vmem:[%s5599_s3 + $0x5b4] sm:$0xf0]  ;;  %v3895_v63 = vor.u32 %v4795_v55, %v3894_v54 }
  0xe7   : > { %2239 = vmatpush.bf16.msra.mxu2 %v3591_v61  ;;  %v4150_v59 = vld [vmem:[%s5599_s3 + $0x6a8] sm:$0xf]  ;;  %v4859_v60 = vld [vmem:[%s5599_s3 + $0x6b4] sm:$0xf0]  ;;  %v4023_v0 = vor.u32 %v4827_v58, %v4022_v56 }
  0xe8   : > { %2252 = vmatpush.bf16.msra.mxu3 %v3719_v1  ;;  %v4278_v61 = vld [vmem:[%s5599_s3 + $0x7a8] sm:$0xf]  ;;  %v4891_v62 = vld [vmem:[%s5599_s3 + $0x7b4] sm:$0xf0]  ;;  %v4151_v1 = vor.u32 %v4859_v60, %v4150_v59 }
  0xe9   : > { %2214 = vmatpush.bf16.msra.mxu0 %v3319_v7  ;;  %v3878_v2 = vld [vmem:[%s5599_s3 + $0x488] sm:$0xf]  ;;  %v4791_v3 = vld [vmem:[%s5599_s3 + $0x494] sm:$0xf0]  ;;  %v4279_v5 = vor.u32 %v4891_v62, %v4278_v61 }
  0xea   : > { %2227 = vmatpush.bf16.msra.mxu1 %v3447_v10  ;;  %v4006_v4 = vld [vmem:[%s5599_s3 + $0x588] sm:$0xf]  ;;  %v4823_v6 = vld [vmem:[%s5599_s3 + $0x594] sm:$0xf0] }
  0xeb   : > { %2240 = vmatpush.bf16.msra.mxu2 %v3575_v11  ;;  %v4134_v7 = vld [vmem:[%s5599_s3 + $0x688] sm:$0xf]  ;;  %v4855_v8 = vld [vmem:[%s5599_s3 + $0x694] sm:$0xf0]  ;;  %v3879_v11 = vor.u32 %v4791_v3, %v3878_v2  ;;  %v4007_v12 = vor.u32 %v4823_v6, %v4006_v4  ;;  %v4673_v6 = vld [vmem:[%s5599_s3 + $0xec] sm:$0xf] }
  0xec   : > { %2253 = vmatpush.bf16.msra.mxu3 %v3703_v15  ;;  %v4262_v9 = vld [vmem:[%s5599_s3 + $0x788] sm:$0xf]  ;;  %v4887_v10 = vld [vmem:[%s5599_s3 + $0x794] sm:$0xf0]  ;;  %v4135_v13 = vor.u32 %v4855_v8, %v4134_v7  ;;  %v3416_v7 = vld [vmem:[%s5599_s3 + $0xf8] sm:$0xf0] }
  0xed   : > { %2215 = vmatpush.bf16.msra.mxu0 %v3303_v22  ;;  %v3862_v14 = vld [vmem:[%s5599_s3 + $0x468] sm:$0xf]  ;;  %v4787_v15 = vld [vmem:[%s5599_s3 + $0x474] sm:$0xf0]  ;;  %v4263_v17 = vor.u32 %v4887_v10, %v4262_v9  ;;  %v4705_v8 = vld [vmem:[%s5599_s3 + $0x1ec] sm:$0xf] }
  0xee   : > { %2228 = vmatpush.bf16.msra.mxu1 %v3431_v28  ;;  %v3990_v16 = vld [vmem:[%s5599_s3 + $0x568] sm:$0xf]  ;;  %v4819_v18 = vld [vmem:[%s5599_s3 + $0x574] sm:$0xf0]  ;;  %v3863_v23 = vor.u32 %v4787_v15, %v3862_v14 }
  0xef   : > { %2241 = vmatpush.bf16.msra.mxu2 %v3559_v29  ;;  %v4118_v19 = vld [vmem:[%s5599_s3 + $0x668] sm:$0xf]  ;;  %v4851_v20 = vld [vmem:[%s5599_s3 + $0x674] sm:$0xf0]  ;;  %v3991_v24 = vor.u32 %v4819_v18, %v3990_v16  ;;  %v3800_v18 = vld [vmem:[%s5599_s3 + $0x3f8] sm:$0xf0] }
  0xf0   : > { %2254 = vmatpush.bf16.msra.mxu3 %v3687_v34  ;;  %2216 = vmatmul.bf16.vlgmr.msra.gmra.mxu0 %v5723_v27  ;;  %v4246_v21 = vld [vmem:[%s5599_s3 + $0x768] sm:$0xf]  ;;  %v4883_v22 = vld [vmem:[%s5599_s3 + $0x774] sm:$0xf0]  ;;  %v4119_v25 = vor.u32 %v4851_v20, %v4118_v19  ;;  %v3419_v20 = vor.u32 %v4673_v6, %v3416_v7 }
  0xf1   : > { %2260 = vmatpush.bf16.msrb.mxu0 %v3927_v35  ;;  %2229 = vmatmul.bf16.vlgmr.msra.gmra.mxu1 %v5729_v33  ;;  %v3846_v28 = vld [vmem:[%s5599_s3 + $0x448] sm:$0xf]  ;;  %v4783_v29 = vld [vmem:[%s5599_s3 + $0x454] sm:$0xf0]  ;;  %v4247_v31 = vor.u32 %v4883_v22, %v4246_v21 }
  0xf2   : > { %2273 = vmatpush.bf16.msrb.mxu1 %v4055_v36  ;;  %2242 = vmatmul.bf16.vlgmr.msra.gmra.mxu2 %v5721_v26  ;;  %v3974_v30 = vld [vmem:[%s5599_s3 + $0x548] sm:$0xf]  ;;  %v4815_v34 = vld [vmem:[%s5599_s3 + $0x554] sm:$0xf0]  ;;  %v3847_v42 = vor.u32 %v4783_v29, %v3846_v28  ;;  %v4701_v28 = vld [vmem:[%s5599_s3 + $0x1cc] sm:$0xf] }
  0xf3   : > { %2286 = vmatpush.bf16.msrb.mxu2 %v4183_v38  ;;  %2255 = vmatmul.bf16.vlgmr.msra.gmra.mxu3 %v5727_v32  ;;  %v4102_v35 = vld [vmem:[%s5599_s3 + $0x648] sm:$0xf]  ;;  %v4847_v36 = vld [vmem:[%s5599_s3 + $0x654] sm:$0xf0]  ;;  %v3975_v44 = vor.u32 %v4815_v34, %v3974_v30  ;;  %v3528_v34 = vld [vmem:[%s5599_s3 + $0x1d8] sm:$0xf0] }
  0xf4   : > { %2299 = vmatpush.bf16.msrb.mxu3 %v4311_v45  ;;  %v4230_v38 = vld [vmem:[%s5599_s3 + $0x748] sm:$0xf]  ;;  %v4879_v39 = vld [vmem:[%s5599_s3 + $0x754] sm:$0xf0]  ;;  %v4103_v45 = vor.u32 %v4847_v36, %v4102_v35  ;;  %v4733_v35 = vld [vmem:[%s5599_s3 + $0x2cc] sm:$0xf] }
  0xf5   : > { %2261 = vmatpush.bf16.msrb.mxu0 %v3911_v51  ;;  %v3830_v46 = vld [vmem:[%s5599_s3 + $0x428] sm:$0xf]  ;;  %v4779_v47 = vld [vmem:[%s5599_s3 + $0x434] sm:$0xf0]  ;;  %v4231_v49 = vor.u32 %v4879_v39, %v4230_v38  ;;  %v3656_v36 = vld [vmem:[%s5599_s3 + $0x2d8] sm:$0xf0] }
  0xf6   : > { %2274 = vmatpush.bf16.msrb.mxu1 %v4039_v52  ;;  %v3958_v48 = vld [vmem:[%s5599_s3 + $0x528] sm:$0xf]  ;;  %v4811_v50 = vld [vmem:[%s5599_s3 + $0x534] sm:$0xf0]  ;;  %v3831_v56 = vor.u32 %v4779_v47, %v3830_v46  ;;  %v4765_v39 = vld [vmem:[%s5599_s3 + $0x3cc] sm:$0xf]  ;;  %v3659_v46 = vor.u32 %v4733_v35, %v3656_v36 }
  0xf7   : > { %2287 = vmatpush.bf16.msrb.mxu2 %v4167_v53  ;;  %v4086_v51 = vld [vmem:[%s5599_s3 + $0x628] sm:$0xf]  ;;  %v4843_v52 = vld [vmem:[%s5599_s3 + $0x634] sm:$0xf0]  ;;  %v3959_v60 = vor.u32 %v4811_v50, %v3958_v48  ;;  %v4665_v47 = vld [vmem:[%s5599_s3 + $0xac] sm:$0xf] }
  0xf8   : > { %2300 = vmatpush.bf16.msrb.mxu3 %v4295_v57  ;;  %v4214_v53 = vld [vmem:[%s5599_s3 + $0x728] sm:$0xf]  ;;  %v4875_v54 = vld [vmem:[%s5599_s3 + $0x734] sm:$0xf0]  ;;  %v4087_v61 = vor.u32 %v4843_v52, %v4086_v51  ;;  %v3384_v48 = vld [vmem:[%s5599_s3 + $0xb8] sm:$0xf0] }
  0xf9   : > { %2262 = vmatpush.bf16.msrb.mxu0 %v3895_v63  ;;  %v3814_v57 = vld [vmem:[%s5599_s3 + $0x408] sm:$0xf]  ;;  %v4775_v58 = vld [vmem:[%s5599_s3 + $0x414] sm:$0xf0]  ;;  %v4215_v2 = vor.u32 %v4875_v54, %v4214_v53  ;;  %v3512_v52 = vld [vmem:[%s5599_s3 + $0x1b8] sm:$0xf0] }
  0xfa   : > { %2275 = vmatpush.bf16.msrb.mxu1 %v4023_v0  ;;  %v3942_v62 = vld [vmem:[%s5599_s3 + $0x508] sm:$0xf]  ;;  %v4807_v63 = vld [vmem:[%s5599_s3 + $0x514] sm:$0xf0]  ;;  %v3815_v10 = vor.u32 %v4775_v58, %v3814_v57  ;;  %v4729_v53 = vld [vmem:[%s5599_s3 + $0x2ac] sm:$0xf]  ;;  %v3387_v57 = vor.u32 %v4665_v47, %v3384_v48 }
  0xfb   : > { %2288 = vmatpush.bf16.msrb.mxu2 %v4151_v1  ;;  %v4070_v0 = vld [vmem:[%s5599_s3 + $0x608] sm:$0xf]  ;;  %v4839_v3 = vld [vmem:[%s5599_s3 + $0x614] sm:$0xf0]  ;;  %v3943_v15 = vor.u32 %v4807_v63, %v3942_v62  ;;  %v3640_v54 = vld [vmem:[%s5599_s3 + $0x2b8] sm:$0xf0] }
  0xfc   : > { %2301 = vmatpush.bf16.msrb.mxu3 %v4279_v5  ;;  %v4198_v4 = vld [vmem:[%s5599_s3 + $0x708] sm:$0xf]  ;;  %v4871_v5 = vld [vmem:[%s5599_s3 + $0x714] sm:$0xf0]  ;;  %v4071_v16 = vor.u32 %v4839_v3, %v4070_v0  ;;  %v3368_v62 = vld [vmem:[%s5599_s3 + $0x98] sm:$0xf0] }
  0xfd   : > { %2263 = vmatpush.bf16.msrb.mxu0 %v3879_v11  ;;  %v3544_v11 = vld [vmem:[%s5599_s3 + $0x1f8] sm:$0xf0]  ;;  %v4199_v19 = vor.u32 %v4871_v5, %v4198_v4  ;;  %v4693_v63 = vld [vmem:[%s5599_s3 + $0x18c] sm:$0xf] }
  0xfe   : > { %2276 = vmatpush.bf16.msrb.mxu1 %v4007_v12  ;;  %v4737_v12 = vld [vmem:[%s5599_s3 + $0x2ec] sm:$0xf]  ;;  %v3547_v22 = vor.u32 %v4705_v8, %v3544_v11  ;;  %v3624_v3 = vld [vmem:[%s5599_s3 + $0x298] sm:$0xf0] }
  0xff   : > { %2289 = vmatpush.bf16.msrb.mxu2 %v4135_v13  ;;  %v2009_v55 = vpop.f32.mrf.mxu0  ;;  %v3672_v13 = vld [vmem:[%s5599_s3 + $0x2f8] sm:$0xf0]  ;;  %v4757_v4 = vld [vmem:[%s5599_s3 + $0x38c] sm:$0xf] }
 0x100   : > { %2302 = vmatpush.bf16.msrb.mxu3 %v4263_v17  ;;  %v2022_v59 = vpop.f32.mrf.mxu1  ;;  %v4769_v17 = vld [vmem:[%s5599_s3 + $0x3ec] sm:$0xf]  ;;  %v3752_v5 = vld [vmem:[%s5599_s3 + $0x398] sm:$0xf0] }
 0x101   : > { %2264 = vmatpush.bf16.msrb.mxu0 %v3863_v23  ;;  %v2023_v1 = vadd.f32 %v2022_v59, %v2009_v55  ;;  %v3675_v23 = vor.u32 %v4737_v12, %v3672_v13  ;;  %v4761_v55 = vld [vmem:[%s5599_s3 + $0x3ac] sm:$0xf]  ;;  %v3352_v11 = vld [vmem:[%s5599_s3 + $0x78] sm:$0xf0] }
 0x102   : > { %2277 = vmatpush.bf16.msrb.mxu1 %v3991_v24  ;;  %v4669_v24 = vld [vmem:[%s5599_s3 + $0xcc] sm:$0xf]  ;;  %v3592_v36 = vld [vmem:[%s5599_s3 + $0x258] sm:$0xf0] }
 0x103   : > { %2290 = vmatpush.bf16.msrb.mxu2 %v4119_v25  ;;  %v3400_v25 = vld [vmem:[%s5599_s3 + $0xd8] sm:$0xf0]  ;;  %v4689_v12 = vld [vmem:[%s5599_s3 + $0x16c] sm:$0xf] }
 0x104   : > { %2303 = vmatpush.bf16.msrb.mxu3 %v4247_v31  ;;  %v3803_v31 = vor.u32 %v4769_v17, %v3800_v18  ;;  %v4721_v17 = vld [vmem:[%s5599_s3 + $0x26c] sm:$0xf]  ;;  %v3608_v18 = vld [vmem:[%s5599_s3 + $0x278] sm:$0xf0] }
 0x105   : > { %2265 = vmatpush.bf16.msrb.mxu0 %v3847_v42  ;;  %v2035_v9 = vpop.f32.mrf.mxu2  ;;  %v3784_v42 = vld [vmem:[%s5599_s3 + $0x3d8] sm:$0xf0]  ;;  %v4717_v35 = vld [vmem:[%s5599_s3 + $0x24c] sm:$0xf] }
 0x106   : > { %2278 = vmatpush.bf16.msrb.mxu1 %v3975_v44  ;;  %v2036_v14 = vadd.f32 %v2035_v9, %v2023_v1  ;;  %v2048_v21 = vpop.f32.mrf.mxu3  ;;  %v3403_v44 = vor.u32 %v4669_v24, %v3400_v25  ;;  %v3787_v51 = vor.u32 %v4765_v39, %v3784_v42  ;;  %v3496_v1 = vld [vmem:[%s5599_s3 + $0x198] sm:$0xf0]  ;;  %v3611_v24 = vor.u32 %v4721_v17, %v3608_v18  ;;  %v4653_v25 = vld [vmem:[%s5599_s3 + $0x4c] sm:$0xf] }
 0x107   : > { %2291 = vmatpush.bf16.msrb.mxu2 %v4103_v45  ;;  %v2011_v30 = vpop.f32.mrf.mxu0  ;;  %v3531_v45 = vor.u32 %v4701_v28, %v3528_v34  ;;  %v3499_v8 = vor.u32 %v4693_v63, %v3496_v1  ;;  %v3336_v28 = vld [vmem:[%s5599_s3 + $0x58] sm:$0xf0]  ;;  %v4749_v42 = vld [vmem:[%s5599_s3 + $0x34c] sm:$0xf] }
 0x108   : > { %2304 = vmatpush.bf16.msrb.mxu3 %v4231_v49  ;;  %v2049_v29 = vadd.f32 %v2048_v21, %v2036_v14  ;;  %v2024_v38 = vpop.f32.mrf.mxu1  ;;  %v4697_v49 = vld [vmem:[%s5599_s3 + $0x1ac] sm:$0xf]  ;;  %v3464_v34 = vld [vmem:[%s5599_s3 + $0x158] sm:$0xf0] }
 0x109   : > { %2266 = vmatpush.bf16.msrb.mxu0 %v3831_v56  ;;  %v3768_v56 = vld [vmem:[%s5599_s3 + $0x3b8] sm:$0xf0]  ;;  %v3515_v59 = vor.u32 %v4697_v49, %v3512_v52  ;;  %v3595_v49 = vor.u32 %v4717_v35, %v3592_v36  ;;  %v4681_v52 = vld [vmem:[%s5599_s3 + $0x12c] sm:$0xf] }
 0x10a   : > { %2279 = vmatpush.bf16.msrb.mxu1 %v3959_v60  ;;  %v3643_v60 = vor.u32 %v4729_v53, %v3640_v54  ;;  %v3771_v0 = vor.u32 %v4761_v55, %v3768_v56  ;;  %v3448_v55 = vld [vmem:[%s5599_s3 + $0x138] sm:$0xf0]  ;;  %v4713_v56 = vld [vmem:[%s5599_s3 + $0x22c] sm:$0xf] }
 0x10b   : > { %2292 = vmatpush.bf16.msrb.mxu2 %v4087_v61  ;;  %v4661_v61 = vld [vmem:[%s5599_s3 + $0x8c] sm:$0xf]  ;;  %v3451_v63 = vor.u32 %v4681_v52, %v3448_v55  ;;  %v4168_v35 = vld [vmem:[%s5599_s3 + $0x6d8] sm:$0xf0] }
 0x10c   : > { %2305 = vmatpush.bf16.msrb.mxu3 %v4215_v2  ;;  %v4725_v2 = vld [vmem:[%s5599_s3 + $0x28c] sm:$0xf]  ;;  %v3371_v6 = vor.u32 %v4661_v61, %v3368_v62  ;;  %v3304_v62 = vld [vmem:[%s5599_s3 + $0x18] sm:$0xf0] }
 0x10d   : > { %2267 = vmatpush.bf16.msrb.mxu0 %v3815_v10  ;;  %v2037_v50 = vpop.f32.mrf.mxu2  ;;  %v3627_v9 = vor.u32 %v4725_v2, %v3624_v3  ;;  %v4657_v10 = vld [vmem:[%s5599_s3 + $0x6c] sm:$0xf]  ;;  %v3432_v2 = vld [vmem:[%s5599_s3 + $0x118] sm:$0xf0] }
 0x10e   : > { %2280 = vmatpush.bf16.msrb.mxu1 %v3943_v15  ;;  %v2050_v58 = vpop.f32.mrf.mxu3  ;;  %v3755_v15 = vor.u32 %v4757_v4, %v3752_v5  ;;  %v4649_v50 = vld [vmem:[%s5599_s3 + $0x2c] sm:$0xf]  ;;  %v4152_v52 = vld [vmem:[%s5599_s3 + $0x6b8] sm:$0xf0] }
 0x10f   : > { %2293 = vmatpush.bf16.msrb.mxu2 %v4071_v16  ;;  %v3480_v16 = vld [vmem:[%s5599_s3 + $0x178] sm:$0xf0]  ;;  %v4745_v58 = vld [vmem:[%s5599_s3 + $0x32c] sm:$0xf] }
 0x110   : > { %2306 = vmatpush.bf16.msrb.mxu3 %v4199_v19  ;;  %2268 = vmatmul.bf16.vlgmr.msrb.gmra.mxu0 %v5778_v40  ;;  %v2061_v7 = vpop.f32.mrf.mxu0  ;;  %v4753_v19 = vld [vmem:[%s5599_s3 + $0x36c] sm:$0xf] }
 0x111   : > { %2312 = vmatpush.bf16.msra.mxu0 %v3419_v20  ;;  %2281 = vmatmul.bf16.vlgmr.msrb.gmra.mxu1 %v5782_v43  ;;  %v2062_v13 = vadd.f32 %v2061_v7, %v2049_v29  ;;  %v2074_v14 = vpop.f32.mrf.mxu1  ;;  %v3736_v20 = vld [vmem:[%s5599_s3 + $0x378] sm:$0xf0]  ;;  %v4685_v29 = vld [vmem:[%s5599_s3 + $0x14c] sm:$0xf] }
 0x112   : > { %2325 = vmatpush.bf16.msra.mxu1 %v3547_v22  ;;  %2294 = vmatmul.bf16.vlgmr.msrb.gmra.mxu2 %v5774_v37  ;;  %v3355_v22 = vor.u32 %v4657_v10, %v3352_v11  ;;  %v3467_v48 = vor.u32 %v4685_v29, %v3464_v34  ;;  %v4645_v61 = vld [vmem:[%s5599_s3 + $0xc] sm:$0xf]  ;;  %v3928_v11 = vld [vmem:[%s5599_s3 + $0x4f8] sm:$0xf0] }
 0x113   : > { %2338 = vmatpush.bf16.msra.mxu2 %v3675_v23  ;;  %2307 = vmatmul.bf16.vlgmr.msrb.gmra.mxu3 %v5780_v41  ;;  %v2075_v21 = vadd.f32 %v2074_v14, %v2062_v13  ;;  %v3483_v23 = vor.u32 %v4689_v12, %v3480_v16  ;;  %v4677_v1 = vld [vmem:[%s5599_s3 + $0x10c] sm:$0xf]  ;;  %v3307_v13 = vor.u32 %v4645_v61, %v3304_v62  ;;  %v4056_v14 = vld [vmem:[%s5599_s3 + $0x5f8] sm:$0xf0] }
 0x114   : > { %2351 = vmatpush.bf16.msra.mxu3 %v3803_v31  ;;  %v3739_v31 = vor.u32 %v4753_v19, %v3736_v20  ;;  %v4709_v3 = vld [vmem:[%s5599_s3 + $0x20c] sm:$0xf]  ;;  %v4184_v16 = vld [vmem:[%s5599_s3 + $0x6f8] sm:$0xf0]  ;;  %v3435_v17 = vor.u32 %v4677_v1, %v3432_v2 }
 0x115   : > { %2313 = vmatpush.bf16.msra.mxu0 %v3403_v44  ;;  %v2087_v30 = vpop.f32.mrf.mxu2  ;;  %v3720_v44 = vld [vmem:[%s5599_s3 + $0x358] sm:$0xf0]  ;;  %v4741_v7 = vld [vmem:[%s5599_s3 + $0x30c] sm:$0xf] }
 0x116   : > { %2326 = vmatpush.bf16.msra.mxu1 %v3531_v45  ;;  %v2088_v38 = vadd.f32 %v2087_v30, %v2075_v21  ;;  %v3339_v45 = vor.u32 %v4653_v25, %v3336_v28  ;;  %v3723_v54 = vor.u32 %v4749_v42, %v3720_v44  ;;  %v4801_v10 = vld [vmem:[%s5599_s3 + $0x4ec] sm:$0xf]  ;;  %v4312_v20 = vld [vmem:[%s5599_s3 + $0x7f8] sm:$0xf0] }
 0x117   : > { %2339 = vmatpush.bf16.msra.mxu2 %v3659_v46  ;;  %v4833_v12 = vld [vmem:[%s5599_s3 + $0x5ec] sm:$0xf]  ;;  %v3912_v28 = vld [vmem:[%s5599_s3 + $0x4d8] sm:$0xf0] }
 0x118   : > { %2352 = vmatpush.bf16.msra.mxu3 %v3787_v51  ;;  %v2100_v39 = vpop.f32.mrf.mxu3  ;;  %v2063_v47 = vpop.f32.mrf.mxu0  ;;  %v3320_v51 = vld [vmem:[%s5599_s3 + $0x38] sm:$0xf0]  ;;  %v4897_v19 = vld [vmem:[%s5599_s3 + $0x7ec] sm:$0xf] }
 0x119   : > { %2314 = vmatpush.bf16.msra.mxu0 %v3387_v57  ;;  %v6092_v46 = vadd.f32 %v2100_v39, %v2088_v38  ;;  %v2076_v53 = vpop.f32.mrf.mxu1  ;;  %v3576_v57 = vld [vmem:[%s5599_s3 + $0x238] sm:$0xf0]  ;;  %v4797_v25 = vld [vmem:[%s5599_s3 + $0x4cc] sm:$0xf]  ;;  %v4315_v30 = vor.u32 %v4897_v19, %v4312_v20 }
 0x11a   : > { %2327 = vmatpush.bf16.msra.mxu1 %v3515_v59  ;;  %v3704_v59 = vld [vmem:[%s5599_s3 + $0x338] sm:$0xf0]  ;;  %v4829_v29 = vld [vmem:[%s5599_s3 + $0x5cc] sm:$0xf]  ;;  %v3915_v39 = vor.u32 %v4797_v25, %v3912_v28 }
 0x11b   : > { %2340 = vmatpush.bf16.msra.mxu2 %v3643_v60  ;;  %v3323_v60 = vor.u32 %v4649_v50, %v3320_v51  ;;  %v3707_v5 = vor.u32 %v4745_v58, %v3704_v59  ;;  %v4861_v34 = vld [vmem:[%s5599_s3 + $0x6cc] sm:$0xf]  ;;  %v4296_v38 = vld [vmem:[%s5599_s3 + $0x7d8] sm:$0xf0] }
 0x11c   : > { %2353 = vmatpush.bf16.msra.mxu3 %v3771_v0  ;;  %v3579_v0 = vor.u32 %v4713_v56, %v3576_v57  ;;  %v4893_v36 = vld [vmem:[%s5599_s3 + $0x7cc] sm:$0xf]  ;;  %v4171_v44 = vor.u32 %v4861_v34, %v4168_v35  ;;  %v3896_v47 = vld [vmem:[%s5599_s3 + $0x4b8] sm:$0xf0] }
 0x11d   : > { %2315 = vmatpush.bf16.msra.mxu0 %v3371_v6  ;;  %v2089_v4 = vpop.f32.mrf.mxu2  ;;  %v3560_v6 = vld [vmem:[%s5599_s3 + $0x218] sm:$0xf0]  ;;  %v4857_v51 = vld [vmem:[%s5599_s3 + $0x6ac] sm:$0xf] }
 0x11e   : > { %2328 = vmatpush.bf16.msra.mxu1 %v3499_v8  ;;  %v3688_v8 = vld [vmem:[%s5599_s3 + $0x318] sm:$0xf0]  ;;  %v3563_v18 = vor.u32 %v4709_v3, %v3560_v6  ;;  %v4889_v53 = vld [vmem:[%s5599_s3 + $0x7ac] sm:$0xf]  ;;  %v4155_v56 = vor.u32 %v4857_v51, %v4152_v52 }
 0x11f   : > { %2341 = vmatpush.bf16.msra.mxu2 %v3627_v9  ;;  %v3691_v21 = vor.u32 %v4741_v7, %v3688_v8  ;;  %v4024_v50 = vld [vmem:[%s5599_s3 + $0x5b8] sm:$0xf0]  ;;  %v4789_v57 = vld [vmem:[%s5599_s3 + $0x48c] sm:$0xf] }
 0x120   : > { %2354 = vmatpush.bf16.msra.mxu3 %v3755_v15  ;;  %v2102_v9 = vpop.f32.mrf.mxu3  ;;  %v4865_v15 = vld [vmem:[%s5599_s3 + $0x6ec] sm:$0xf]  ;;  %v3880_v58 = vld [vmem:[%s5599_s3 + $0x498] sm:$0xf0] }
 0x121   : > { %2316 = vmatpush.bf16.msra.mxu0 %v3355_v22  ;;  %v3931_v22 = vor.u32 %v4801_v10, %v3928_v11  ;;  %v4821_v59 = vld [vmem:[%s5599_s3 + $0x58c] sm:$0xf]  ;;  %v4136_v61 = vld [vmem:[%s5599_s3 + $0x698] sm:$0xf0] }
 0x122   : > { %2329 = vmatpush.bf16.msra.mxu1 %v3483_v23  ;;  %v4059_v23 = vor.u32 %v4833_v12, %v4056_v14  ;;  %v4885_v62 = vld [vmem:[%s5599_s3 + $0x78c] sm:$0xf]  ;;  %v3864_v4 = vld [vmem:[%s5599_s3 + $0x478] sm:$0xf0] }
 0x123   : > { %2342 = vmatpush.bf16.msra.mxu2 %v3611_v24  ;;  %v4187_v24 = vor.u32 %v4865_v15, %v4184_v16  ;;  %v4785_v3 = vld [vmem:[%s5599_s3 + $0x46c] sm:$0xf]  ;;  %v3992_v8 = vld [vmem:[%s5599_s3 + $0x578] sm:$0xf0] }
 0x124   : > { %2355 = vmatpush.bf16.msra.mxu3 %v3739_v31  ;;  %v4040_v31 = vld [vmem:[%s5599_s3 + $0x5d8] sm:$0xf0]  ;;  %v4849_v9 = vld [vmem:[%s5599_s3 + $0x66c] sm:$0xf]  ;;  %v3867_v14 = vor.u32 %v4785_v3, %v3864_v4 }
 0x125   : > { %2317 = vmatpush.bf16.msra.mxu0 %v3339_v45  ;;  %v4043_v42 = vor.u32 %v4829_v29, %v4040_v31  ;;  %v4793_v45 = vld [vmem:[%s5599_s3 + $0x4ac] sm:$0xf]  ;;  %v4120_v10 = vld [vmem:[%s5599_s3 + $0x678] sm:$0xf0] }
 0x126   : > { %2330 = vmatpush.bf16.msra.mxu1 %v3467_v48  ;;  %v4825_v48 = vld [vmem:[%s5599_s3 + $0x5ac] sm:$0xf]  ;;  %v3899_v55 = vor.u32 %v4793_v45, %v3896_v47  ;;  %v4123_v16 = vor.u32 %v4849_v9, %v4120_v10  ;;  %v4216_v52 = vld [vmem:[%s5599_s3 + $0x738] sm:$0xf0] }
 0x127   : > { %2343 = vmatpush.bf16.msra.mxu2 %v3595_v49  ;;  %v4299_v49 = vor.u32 %v4893_v36, %v4296_v38  ;;  %v4881_v12 = vld [vmem:[%s5599_s3 + $0x76c] sm:$0xf] }
 0x128   : > { %2356 = vmatpush.bf16.msra.mxu3 %v3723_v54  ;;  %v4280_v54 = vld [vmem:[%s5599_s3 + $0x7b8] sm:$0xf0]  ;;  %v4813_v19 = vld [vmem:[%s5599_s3 + $0x54c] sm:$0xf] }
 0x129   : > { %2318 = vmatpush.bf16.msra.mxu0 %v3323_v60  ;;  %v4008_v60 = vld [vmem:[%s5599_s3 + $0x598] sm:$0xf0]  ;;  %v4877_v29 = vld [vmem:[%s5599_s3 + $0x74c] sm:$0xf] }
 0x12a   : > { %2331 = vmatpush.bf16.msra.mxu1 %v3451_v63  ;;  %v4264_v63 = vld [vmem:[%s5599_s3 + $0x798] sm:$0xf0]  ;;  %v4011_v1 = vor.u32 %v4821_v59, %v4008_v60  ;;  %v4873_v51 = vld [vmem:[%s5599_s3 + $0x72c] sm:$0xf] }
 0x12b   : > { %2344 = vmatpush.bf16.msra.mxu2 %v3579_v0  ;;  %v4267_v7 = vor.u32 %v4885_v62, %v4264_v63  ;;  %v4219_v59 = vor.u32 %v4873_v51, %v4216_v52  ;;  %v4837_v60 = vld [vmem:[%s5599_s3 + $0x60c] sm:$0xf]  ;;  %v4200_v63 = vld [vmem:[%s5599_s3 + $0x718] sm:$0xf0] }
 0x12c   : > { %2357 = vmatpush.bf16.msra.mxu3 %v3707_v5  ;;  %v4817_v5 = vld [vmem:[%s5599_s3 + $0x56c] sm:$0xf] }
 0x12d   : > { %2319 = vmatpush.bf16.msra.mxu0 %v3307_v13  ;;  %v2113_v0 = vpop.f32.mrf.mxu0  ;;  %v4248_v13 = vld [vmem:[%s5599_s3 + $0x778] sm:$0xf0]  ;;  %v3995_v15 = vor.u32 %v4817_v5, %v3992_v8  ;;  %v4869_v62 = vld [vmem:[%s5599_s3 + $0x70c] sm:$0xf] }
 0x12e   : > { %2332 = vmatpush.bf16.msra.mxu1 %v3435_v17  ;;  %v2126_v6 = vpop.f32.mrf.mxu1  ;;  %v4781_v17 = vld [vmem:[%s5599_s3 + $0x44c] sm:$0xf] }
 0x12f   : > { %2345 = vmatpush.bf16.msra.mxu2 %v3563_v18  ;;  %v2127_v11 = vadd.f32 %v2126_v6, %v2113_v0  ;;  %v3848_v18 = vld [vmem:[%s5599_s3 + $0x458] sm:$0xf0] }
 0x130   : > { %2358 = vmatpush.bf16.msra.mxu3 %v3691_v21  ;;  %2320 = vmatmul.bf16.vlgmr.msra.gmra.mxu0 %v5723_v27  ;;  %v4283_v27 = vor.u32 %v4889_v53, %v4280_v54  ;;  %v4251_v21 = vor.u32 %v4881_v12, %v4248_v13  ;;  %v3851_v31 = vor.u32 %v4781_v17, %v3848_v18 }
 0x131   : > { %2364 = vmatpush.bf16.msrb.mxu0 %v3931_v22  ;;  %2333 = vmatmul.bf16.vlgmr.msra.gmra.mxu1 %v5729_v33  ;;  %v3883_v33 = vor.u32 %v4789_v57, %v3880_v58  ;;  %v3976_v22 = vld [vmem:[%s5599_s3 + $0x558] sm:$0xf0]  ;;  %v4805_v57 = vld [vmem:[%s5599_s3 + $0x50c] sm:$0xf] }
 0x132   : > { %2377 = vmatpush.bf16.msrb.mxu1 %v4059_v23  ;;  %2346 = vmatmul.bf16.vlgmr.msra.gmra.mxu2 %v5721_v26  ;;  %v4027_v26 = vor.u32 %v4825_v48, %v4024_v50  ;;  %v4845_v23 = vld [vmem:[%s5599_s3 + $0x64c] sm:$0xf]  ;;  %v3979_v36 = vor.u32 %v4813_v19, %v3976_v22  ;;  %v3960_v48 = vld [vmem:[%s5599_s3 + $0x538] sm:$0xf0] }
 0x133   : > { %2390 = vmatpush.bf16.msrb.mxu2 %v4187_v24  ;;  %2359 = vmatmul.bf16.vlgmr.msra.gmra.mxu3 %v5727_v32  ;;  %v4853_v32 = vld [vmem:[%s5599_s3 + $0x68c] sm:$0xf]  ;;  %v4104_v24 = vld [vmem:[%s5599_s3 + $0x658] sm:$0xf0] }
 0x134   : > { %2403 = vmatpush.bf16.msrb.mxu3 %v4315_v30  ;;  %v4139_v2 = vor.u32 %v4853_v32, %v4136_v61  ;;  %v4232_v30 = vld [vmem:[%s5599_s3 + $0x758] sm:$0xf0]  ;;  %v4107_v38 = vor.u32 %v4845_v23, %v4104_v24 }
 0x135   : > { %2365 = vmatpush.bf16.msrb.mxu0 %v3915_v39  ;;  %v2139_v20 = vpop.f32.mrf.mxu2  ;;  %v2115_v35 = vpop.f32.mrf.mxu0  ;;  %v4777_v39 = vld [vmem:[%s5599_s3 + $0x42c] sm:$0xf]  ;;  %v4235_v47 = vor.u32 %v4877_v29, %v4232_v30  ;;  %v4088_v50 = vld [vmem:[%s5599_s3 + $0x638] sm:$0xf0] }
 0x136   : > { %2378 = vmatpush.bf16.msrb.mxu1 %v4043_v42  ;;  %v2140_v25 = vadd.f32 %v2139_v20, %v2127_v11  ;;  %v2152_v28 = vpop.f32.mrf.mxu3  ;;  %v3832_v42 = vld [vmem:[%s5599_s3 + $0x438] sm:$0xf0]  ;;  %v2128_v45 = vpop.f32.mrf.mxu1 }
 0x137   : > { %2391 = vmatpush.bf16.msrb.mxu2 %v4171_v44  ;;  %v4809_v44 = vld [vmem:[%s5599_s3 + $0x52c] sm:$0xf]  ;;  %v3835_v53 = vor.u32 %v4777_v39, %v3832_v42  ;;  %v4072_v32 = vld [vmem:[%s5599_s3 + $0x618] sm:$0xf0] }
 0x138   : > { %2404 = vmatpush.bf16.msrb.mxu3 %v4299_v49  ;;  %v2153_v34 = vadd.f32 %v2152_v28, %v2140_v25  ;;  %v4841_v49 = vld [vmem:[%s5599_s3 + $0x62c] sm:$0xf]  ;;  %v3963_v54 = vor.u32 %v4809_v44, %v3960_v48 }
 0x139   : > { %2366 = vmatpush.bf16.msrb.mxu0 %v3899_v55  ;;  %v4091_v55 = vor.u32 %v4841_v49, %v4088_v50 }
 0x13a   : > { %2379 = vmatpush.bf16.msrb.mxu1 %v4027_v26  ;;  %v4773_v26 = vld [vmem:[%s5599_s3 + $0x40c] sm:$0xf] }
 0x13b   : > { %2392 = vmatpush.bf16.msrb.mxu2 %v4155_v56  ;;  %v3816_v56 = vld [vmem:[%s5599_s3 + $0x418] sm:$0xf0] }
 0x13c   : > { %2405 = vmatpush.bf16.msrb.mxu3 %v4283_v27  ;;  %v3944_v27 = vld [vmem:[%s5599_s3 + $0x518] sm:$0xf0] }
 0x13d   : > { %2367 = vmatpush.bf16.msrb.mxu0 %v3883_v33  ;;  %v2141_v58 = vpop.f32.mrf.mxu2  ;;  %v3819_v33 = vor.u32 %v4773_v26, %v3816_v56  ;;  %v3947_v0 = vor.u32 %v4805_v57, %v3944_v27 }
 0x13e   : > { %2380 = vmatpush.bf16.msrb.mxu1 %v4011_v1  ;;  %v2154_v61 = vpop.f32.mrf.mxu3  ;;  %v4075_v1 = vor.u32 %v4837_v60, %v4072_v32 }
 0x13f   : > { %2393 = vmatpush.bf16.msrb.mxu2 %v4139_v2  ;;  %v4203_v2 = vor.u32 %v4869_v62, %v4200_v63 }
 0x140   : > { %2406 = vmatpush.bf16.msrb.mxu3 %v4267_v7 }
 0x141   : > { %2368 = vmatpush.bf16.msrb.mxu0 %v3867_v14 }
 0x142   : > { %2381 = vmatpush.bf16.msrb.mxu1 %v3995_v15 }
 0x143   : > { %2394 = vmatpush.bf16.msrb.mxu2 %v4123_v16 }
 0x144   : > { %2407 = vmatpush.bf16.msrb.mxu3 %v4251_v21 }
 0x145   : > { %2369 = vmatpush.bf16.msrb.mxu0 %v3851_v31 }
 0x146   : > { %2382 = vmatpush.bf16.msrb.mxu1 %v3979_v36 }
 0x147   : > { %2395 = vmatpush.bf16.msrb.mxu2 %v4107_v38 }
 0x148   : > { %2408 = vmatpush.bf16.msrb.mxu3 %v4235_v47 }
 0x149   : > { %2370 = vmatpush.bf16.msrb.mxu0 %v3835_v53 }
 0x14a   : > { %2383 = vmatpush.bf16.msrb.mxu1 %v3963_v54 }
 0x14b   : > { %2396 = vmatpush.bf16.msrb.mxu2 %v4091_v55 }
 0x14c   : > { %2409 = vmatpush.bf16.msrb.mxu3 %v4219_v59 }
 0x14d   : > { %2371 = vmatpush.bf16.msrb.mxu0 %v3819_v33  ;;  %v2165_v3 = vpop.f32.mrf.mxu0  ;;  %v463_v33 = vld [vmem:[#allocation2] sm:$0xff] }
 0x14e   : > { %2384 = vmatpush.bf16.msrb.mxu1 %v3947_v0  ;;  %v2166_v4 = vadd.f32 %v2165_v3, %v2153_v34  ;;  %v2178_v5 = vpop.f32.mrf.mxu1 }
 0x14f   : > { %2397 = vmatpush.bf16.msrb.mxu2 %v4075_v1 }
 0x150   : > { %2410 = vmatpush.bf16.msrb.mxu3 %v4203_v2  ;;  %2372 = vmatmul.bf16.vlgmr.msrb.gmra.mxu0 %v5778_v40  ;;  %v2179_v6 = vadd.f32 %v2178_v5, %v2166_v4 }
 0x151   : > { %2385 = vmatmul.bf16.vlgmr.msrb.gmra.mxu1 %v5782_v43 }
 0x152   : > { %2398 = vmatmul.bf16.vlgmr.msrb.gmra.mxu2 %v5774_v37 }
 0x153   : > { %2411 = vmatmul.bf16.vlgmr.msrb.gmra.mxu3 %v5780_v41 }
 0x155   : > { %v2191_v7 = vpop.f32.mrf.mxu2  ;;  %v2167_v11 = vpop.f32.mrf.mxu0 }
 0x156   : > { %v2192_v8 = vadd.f32 %v2191_v7, %v2179_v6  ;;  %v2204_v9 = vpop.f32.mrf.mxu3  ;;  %v2180_v12 = vpop.f32.mrf.mxu1 }
 0x158   : > { %v2205_v10 = vadd.f32 %v2204_v9, %v2192_v8 }
 0x15a   : > { %v2420_v13 = vrot.slane %v2205_v10, 6 }
 0x15c   : > { %v2424_v40 = vsel %vm2423_vm0, %v6092_v46, %v2420_v13 }
 0x15d   : > { %v2193_v43 = vpop.f32.mrf.mxu2 }
 0x15e   : > { %v2206_v14 = vpop.f32.mrf.mxu3 }
 0x16d   : > { %v2217_v37 = vpop.f32.mrf.mxu0 }
 0x16e   : > { %v2230_v15 = vpop.f32.mrf.mxu1 }
 0x16f   : > { %v2231_v41 = vadd.f32 %v2230_v15, %v2217_v37 }
 0x175   : > { %v2243_v16 = vpop.f32.mrf.mxu2  ;;  %v2219_v20 = vpop.f32.mrf.mxu0 }
 0x176   : > { %v2244_v17 = vadd.f32 %v2243_v16, %v2231_v41  ;;  %v2256_v18 = vpop.f32.mrf.mxu3  ;;  %v2232_v21 = vpop.f32.mrf.mxu1 }
 0x178   : > { %v2257_v19 = vadd.f32 %v2256_v18, %v2244_v17 }
 0x17d   : > { %v2245_v22 = vpop.f32.mrf.mxu2 }
 0x17e   : > { %v2258_v23 = vpop.f32.mrf.mxu3 }
 0x18d   : > { %v2269_v24 = vpop.f32.mrf.mxu0 }
 0x18e   : > { %v2282_v25 = vpop.f32.mrf.mxu1  ;;  %v2270_v49 = vadd.f32 %v2269_v24, %v2257_v19 }
 0x190   : > { %v2283_v51 = vadd.f32 %v2282_v25, %v2270_v49 }
 0x195   : > { %v2295_v28 = vpop.f32.mrf.mxu2  ;;  %v2271_v30 = vpop.f32.mrf.mxu0 }
 0x196   : > { %v2308_v29 = vpop.f32.mrf.mxu3  ;;  %v2284_v31 = vpop.f32.mrf.mxu1  ;;  %v2296_v26 = vadd.f32 %v2295_v28, %v2283_v51 }
 0x198   : > { %v2309_v58 = vadd.f32 %v2308_v29, %v2296_v26 }
 0x19a   : > { %v2421_v62 = vrot.slane %v2309_v58, 4 }
 0x19d   : > { %v2297_v46 = vpop.f32.mrf.mxu2 }
 0x19e   : > { %v2310_v34 = vpop.f32.mrf.mxu3 }
 0x1ad   : > { %v2321_v35 = vpop.f32.mrf.mxu0 }
 0x1ae   : > { %v2334_v36 = vpop.f32.mrf.mxu1 }
 0x1af   : > { %v2335_v48 = vadd.f32 %v2334_v36, %v2321_v35 }
 0x1b5   : > { %v2347_v38 = vpop.f32.mrf.mxu2  ;;  %v2323_v42 = vpop.f32.mrf.mxu0 }
 0x1b6   : > { %v2360_v39 = vpop.f32.mrf.mxu3  ;;  %v2336_v44 = vpop.f32.mrf.mxu1  ;;  %v2348_v50 = vadd.f32 %v2347_v38, %v2335_v48 }
 0x1b8   : > { %v2361_v52 = vadd.f32 %v2360_v39, %v2348_v50 }
 0x1bd   : > { %v2349_v45 = vpop.f32.mrf.mxu2 }
 0x1be   : > { %v2362_v47 = vpop.f32.mrf.mxu3 }
 0x1cd   : > { %v2373_v53 = vpop.f32.mrf.mxu0 }
 0x1ce   : > { %v2386_v54 = vpop.f32.mrf.mxu1  ;;  %v2374_v55 = vadd.f32 %v2373_v53, %v2361_v52 }
 0x1d0   : > { %v2387_v56 = vadd.f32 %v2386_v54, %v2374_v55 }
 0x1d5   : > { %v2399_v57 = vpop.f32.mrf.mxu2  ;;  %v2375_v60 = vpop.f32.mrf.mxu0 }
 0x1d6   : > { %v2400_v59 = vadd.f32 %v2399_v57, %v2387_v56  ;;  %v2412_v27 = vpop.f32.mrf.mxu3  ;;  %v2388_v32 = vpop.f32.mrf.mxu1 }
 0x1d8   : > { %v2413_v61 = vadd.f32 %v2412_v27, %v2400_v59 }
 0x1da   : > { %v2422_v63 = vrot.slane %v2413_v61, 2 }
 0x1dc   : > { %v2426_v0 = vsel %vm2425_vm1, %v2421_v62, %v2422_v63  ;;  %2435 = sbr.rel (%p4316_p1) target bundleno = 823 (0x337), region = 84 }
 0x1dd   : > { %v2428_v1 = vsel %vm2427_vm2, %v2424_v40, %v2426_v0  ;;  %v2401_v2 = vpop.f32.mrf.mxu2 }
 0x1de   : > { %v2430_v3 = vadd.f32 %v2428_v1, %v463_v33  ;;  %v2414_v4 = vpop.f32.mrf.mxu3 }
 0x1e0   : > { %2431 = vst [vmem:[#allocation2] sm:$0xff] %v2430_v3 }
 0x1e1   : > { %v4375_v5 = vld [vmem:[#allocation9 + $0x70] sm:$0xf]  ;;  %v4915_v6 = vld [vmem:[#allocation9 + $0x74] sm:$0xf0]  ;;  %v4367_v37 = vld [vmem:[#allocation9 + $0x60] sm:$0xf] }
 0x1e2   : > { %v4439_v7 = vld [vmem:[#allocation9 + $0xf0] sm:$0xf]  ;;  %v4376_v8 = vor.u32 %v4915_v6, %v4375_v5  ;;  %v4931_v9 = vld [vmem:[#allocation9 + $0xf4] sm:$0xf0]  ;;  %v4913_v15 = vld [vmem:[#allocation9 + $0x64] sm:$0xf0] }
 0x1e3   : > { %v4503_v10 = vld [vmem:[#allocation9 + $0x170] sm:$0xf]  ;;  %v4947_v11 = vld [vmem:[#allocation9 + $0x174] sm:$0xf0]  ;;  %v4440_v12 = vor.u32 %v4931_v9, %v4439_v7  ;;  %v4431_v41 = vld [vmem:[#allocation9 + $0xe0] sm:$0xf]  ;;  %v4368_v17 = vor.u32 %v4913_v15, %v4367_v37 }
 0x1e4   : > { %v4504_v13 = vor.u32 %v4947_v11, %v4503_v10  ;;  %v4567_v43 = vld [vmem:[#allocation9 + $0x1f0] sm:$0xf]  ;;  %v4963_v14 = vld [vmem:[#allocation9 + $0x1f4] sm:$0xf0]  ;;  %2856 = vmatpush.bf16.msra.mxu0 %v4376_v8  ;;  %v4929_v16 = vld [vmem:[#allocation9 + $0xe4] sm:$0xf0] }
 0x1e5   : > { %v4568_v40 = vor.u32 %v4963_v14, %v4567_v43  ;;  %2869 = vmatpush.bf16.msra.mxu1 %v4440_v12  ;;  %v4432_v18 = vor.u32 %v4929_v16, %v4431_v41  ;;  %v4495_v19 = vld [vmem:[#allocation9 + $0x160] sm:$0xf]  ;;  %v4945_v20 = vld [vmem:[#allocation9 + $0x164] sm:$0xf0]  ;;  %v4359_v24 = vld [vmem:[#allocation9 + $0x50] sm:$0xf] }
 0x1e6   : > { %2882 = vmatpush.bf16.msra.mxu2 %v4504_v13  ;;  %v4559_v21 = vld [vmem:[#allocation9 + $0x1e0] sm:$0xf]  ;;  %v4496_v22 = vor.u32 %v4945_v20, %v4495_v19  ;;  %v4961_v23 = vld [vmem:[#allocation9 + $0x1e4] sm:$0xf0]  ;;  %v4911_v25 = vld [vmem:[#allocation9 + $0x54] sm:$0xf0] }
 0x1e7   : > { %2895 = vmatpush.bf16.msra.mxu3 %v4568_v40  ;;  %v4560_v28 = vor.u32 %v4961_v23, %v4559_v21  ;;  %v4423_v29 = vld [vmem:[#allocation9 + $0xd0] sm:$0xf]  ;;  %v4927_v30 = vld [vmem:[#allocation9 + $0xd4] sm:$0xf0]  ;;  %v4360_v46 = vor.u32 %v4911_v25, %v4359_v24  ;;  %v4351_v42 = vld [vmem:[#allocation9 + $0x40] sm:$0xf] }
 0x1e8   : > { %v4487_v31 = vld [vmem:[#allocation9 + $0x150] sm:$0xf]  ;;  %2857 = vmatpush.bf16.msra.mxu0 %v4368_v17  ;;  %v4943_v34 = vld [vmem:[#allocation9 + $0x154] sm:$0xf0]  ;;  %v4424_v38 = vor.u32 %v4927_v30, %v4423_v29  ;;  %v4909_v44 = vld [vmem:[#allocation9 + $0x44] sm:$0xf0] }
 0x1e9   : > { %v4551_v35 = vld [vmem:[#allocation9 + $0x1d0] sm:$0xf]  ;;  %v4959_v36 = vld [vmem:[#allocation9 + $0x1d4] sm:$0xf0]  ;;  %2870 = vmatpush.bf16.msra.mxu1 %v4432_v18  ;;  %v4488_v39 = vor.u32 %v4943_v34, %v4487_v31  ;;  %v4415_v45 = vld [vmem:[#allocation9 + $0xc0] sm:$0xf]  ;;  %v4352_v53 = vor.u32 %v4909_v44, %v4351_v42 }
 0x1ea   : > { %2883 = vmatpush.bf16.msra.mxu2 %v4496_v22  ;;  %v4552_v47 = vor.u32 %v4959_v36, %v4551_v35  ;;  %v4925_v48 = vld [vmem:[#allocation9 + $0xc4] sm:$0xf0]  ;;  %v4479_v49 = vld [vmem:[#allocation9 + $0x140] sm:$0xf]  ;;  %v4343_v26 = vld [vmem:[#allocation9 + $0x30] sm:$0xf] }
 0x1eb   : > { %2896 = vmatpush.bf16.msra.mxu3 %v4560_v28  ;;  %v4941_v50 = vld [vmem:[#allocation9 + $0x144] sm:$0xf0]  ;;  %v4543_v51 = vld [vmem:[#allocation9 + $0x1c0] sm:$0xf]  ;;  %v4416_v54 = vor.u32 %v4925_v48, %v4415_v45  ;;  %v4907_v56 = vld [vmem:[#allocation9 + $0x34] sm:$0xf0] }
 0x1ec   : > { %v4957_v52 = vld [vmem:[#allocation9 + $0x1c4] sm:$0xf0]  ;;  %2858 = vmatpush.bf16.msra.mxu0 %v4360_v46  ;;  %v4480_v55 = vor.u32 %v4941_v50, %v4479_v49  ;;  %v4407_v57 = vld [vmem:[#allocation9 + $0xb0] sm:$0xf]  ;;  %v4923_v59 = vld [vmem:[#allocation9 + $0xb4] sm:$0xf0]  ;;  %v4344_v62 = vor.u32 %v4907_v56, %v4343_v26 }
 0x1ed   : > { %2871 = vmatpush.bf16.msra.mxu1 %v4424_v38  ;;  %v4544_v58 = vor.u32 %v4957_v52, %v4543_v51  ;;  %v4471_v27 = vld [vmem:[#allocation9 + $0x130] sm:$0xf]  ;;  %v4939_v60 = vld [vmem:[#allocation9 + $0x134] sm:$0xf0]  ;;  %v4408_v63 = vor.u32 %v4923_v59, %v4407_v57  ;;  %v4335_v0 = vld [vmem:[#allocation9 + $0x20] sm:$0xf] }
 0x1ee   : > { %2884 = vmatpush.bf16.msra.mxu2 %v4488_v39  ;;  %v4535_v32 = vld [vmem:[#allocation9 + $0x1b0] sm:$0xf]  ;;  %v4955_v61 = vld [vmem:[#allocation9 + $0x1b4] sm:$0xf0]  ;;  %v4472_v33 = vor.u32 %v4939_v60, %v4471_v27  ;;  %v4905_v1 = vld [vmem:[#allocation9 + $0x24] sm:$0xf0] }
 0x1ef   : > { %2897 = vmatpush.bf16.msra.mxu3 %v4552_v47  ;;  %v4399_v2 = vld [vmem:[#allocation9 + $0xa0] sm:$0xf]  ;;  %v4536_v3 = vor.u32 %v4955_v61, %v4535_v32  ;;  %v4921_v4 = vld [vmem:[#allocation9 + $0xa4] sm:$0xf0]  ;;  %v4336_v9 = vor.u32 %v4905_v1, %v4335_v0  ;;  %v4327_v12 = vld [vmem:[#allocation9 + $0x10] sm:$0xf] }
 0x1f0   : > { %2859 = vmatpush.bf16.msra.mxu0 %v4352_v53  ;;  %v4463_v5 = vld [vmem:[#allocation9 + $0x120] sm:$0xf]  ;;  %v4937_v6 = vld [vmem:[#allocation9 + $0x124] sm:$0xf0]  ;;  %v4400_v10 = vor.u32 %v4921_v4, %v4399_v2  ;;  %v4903_v13 = vld [vmem:[#allocation9 + $0x14] sm:$0xf0] }
 0x1f1   : > { %2872 = vmatpush.bf16.msra.mxu1 %v4416_v54  ;;  %v4527_v7 = vld [vmem:[#allocation9 + $0x1a0] sm:$0xf]  ;;  %v4953_v8 = vld [vmem:[#allocation9 + $0x1a4] sm:$0xf0]  ;;  %v4464_v11 = vor.u32 %v4937_v6, %v4463_v5  ;;  %v4391_v43 = vld [vmem:[#allocation9 + $0x90] sm:$0xf]  ;;  %v4328_v18 = vor.u32 %v4903_v13, %v4327_v12 }
 0x1f2   : > { %2885 = vmatpush.bf16.msra.mxu2 %v4480_v55  ;;  %v4528_v14 = vor.u32 %v4953_v8, %v4527_v7  ;;  %v4919_v37 = vld [vmem:[#allocation9 + $0x94] sm:$0xf0]  ;;  %v4455_v40 = vld [vmem:[#allocation9 + $0x110] sm:$0xf]  ;;  %v4319_v17 = vld [vmem:[#allocation9] sm:$0xf] }
 0x1f3   : > { %2898 = vmatpush.bf16.msra.mxu3 %v4544_v58  ;;  %v4935_v15 = vld [vmem:[#allocation9 + $0x114] sm:$0xf0]  ;;  %v4519_v41 = vld [vmem:[#allocation9 + $0x190] sm:$0xf]  ;;  %v4901_v19 = vld [vmem:[#allocation9 + $0x4] sm:$0xf0]  ;;  %v4392_v22 = vor.u32 %v4919_v37, %v4391_v43 }
 0x1f4   : > { %2860 = vmatpush.bf16.msra.mxu0 %v4344_v62  ;;  %v4951_v16 = vld [vmem:[#allocation9 + $0x194] sm:$0xf0]  ;;  %v4383_v20 = vld [vmem:[#allocation9 + $0x80] sm:$0xf]  ;;  %v4917_v21 = vld [vmem:[#allocation9 + $0x84] sm:$0xf0]  ;;  %v4456_v23 = vor.u32 %v4935_v15, %v4455_v40  ;;  %v4320_v38 = vor.u32 %v4901_v19, %v4319_v17 }
 0x1f5   : > { %2873 = vmatpush.bf16.msra.mxu1 %v4408_v63  ;;  %v4447_v24 = vld [vmem:[#allocation9 + $0x100] sm:$0xf]  ;;  %v4933_v25 = vld [vmem:[#allocation9 + $0x104] sm:$0xf0]  ;;  %v4520_v29 = vor.u32 %v4951_v16, %v4519_v41  ;;  %v4914_v31 = vld [vmem:[#allocation9 + $0x74] sm:$0xf]  ;;  %v4384_v39 = vor.u32 %v4917_v21, %v4383_v20 }
 0x1f6   : > { %2886 = vmatpush.bf16.msra.mxu2 %v4472_v33  ;;  %v4511_v28 = vld [vmem:[#allocation9 + $0x180] sm:$0xf]  ;;  %v4949_v30 = vld [vmem:[#allocation9 + $0x184] sm:$0xf0]  ;;  %v4377_v46 = vld [vmem:[#allocation9 + $0x78] sm:$0xf0]  ;;  %v4448_v42 = vor.u32 %v4933_v25, %v4447_v24 }
 0x1f7   : > { %2899 = vmatpush.bf16.msra.mxu3 %v4536_v3  ;;  %v4930_v34 = vld [vmem:[#allocation9 + $0xf4] sm:$0xf]  ;;  %v4441_v35 = vld [vmem:[#allocation9 + $0xf8] sm:$0xf0]  ;;  %v4512_v53 = vor.u32 %v4949_v30, %v4511_v28  ;;  %v4380_v54 = vor.u32 %v4914_v31, %v4377_v46  ;;  %v4912_v26 = vld [vmem:[#allocation9 + $0x64] sm:$0xf] }
 0x1f8   : > { %2861 = vmatpush.bf16.msra.mxu0 %v4336_v9  ;;  %v4946_v36 = vld [vmem:[#allocation9 + $0x174] sm:$0xf]  ;;  %v4505_v44 = vld [vmem:[#allocation9 + $0x178] sm:$0xf0]  ;;  %v4444_v55 = vor.u32 %v4930_v34, %v4441_v35  ;;  %v4369_v56 = vld [vmem:[#allocation9 + $0x68] sm:$0xf0] }
 0x1f9   : > { %2874 = vmatpush.bf16.msra.mxu1 %v4400_v10  ;;  %v4962_v45 = vld [vmem:[#allocation9 + $0x1f4] sm:$0xf]  ;;  %v2437_v47 = vld [vmem:[#allocation8] sm:$0xf]  ;;  %v4928_v57 = vld [vmem:[#allocation9 + $0xe4] sm:$0xf]  ;;  %v4508_v58 = vor.u32 %v4946_v36, %v4505_v44  ;;  %v4372_v4 = vor.u32 %v4912_v26, %v4369_v56 }
 0x1fa   : > { %2887 = vmatpush.bf16.msra.mxu2 %v4464_v11  ;;  %v4569_v48 = vld [vmem:[#allocation9 + $0x1f8] sm:$0xf0]  ;;  %v2439_v49 = vperm.slane %v2437_v47, 0  ;;  %v2440_v50 = vperm.slane %v2437_v47, 1  ;;  %v2441_v51 = vperm.slane %v2437_v47, 2  ;;  %v2442_v52 = vperm.slane %v2437_v47, 3 }
 0x1fb   : > { %2900 = vmatpush.bf16.msra.mxu3 %v4528_v14  ;;  %v4433_v59 = vld [vmem:[#allocation9 + $0xe8] sm:$0xf0]  ;;  %v4572_v61 = vor.u32 %v4962_v45, %v4569_v48  ;;  %v4944_v62 = vld [vmem:[#allocation9 + $0x164] sm:$0xf]  ;;  %v2436_v33 = vld [vmem:[#allocation2] sm:$0xff] }
 0x1fc   : > { %2862 = vmatpush.bf16.msra.mxu0 %v4328_v18  ;;  %v2443_v27 = vrot.slane %v2440_v50, 6  ;;  %v2444_v60 = vrot.slane %v2441_v51, 4  ;;  %v2445_v32 = vrot.slane %v2442_v52, 2  ;;  %v4497_v63 = vld [vmem:[#allocation9 + $0x168] sm:$0xf0]  ;;  %v4436_v6 = vor.u32 %v4928_v57, %v4433_v59 }
 0x1fd   : > { %2875 = vmatpush.bf16.msra.mxu1 %v4392_v22  ;;  %v4960_v0 = vld [vmem:[#allocation9 + $0x1e4] sm:$0xf]  ;;  %v4561_v1 = vld [vmem:[#allocation9 + $0x1e8] sm:$0xf0]  ;;  %v4500_v7 = vor.u32 %v4944_v62, %v4497_v63  ;;  %v4910_v9 = vld [vmem:[#allocation9 + $0x54] sm:$0xf] }
 0x1fe   : > { %2888 = vmatpush.bf16.msra.mxu2 %v4456_v23  ;;  %v2446_v2 = vsel %vm2423_vm0, %v2439_v49, %v2443_v27  ;;  %v2447_v3 = vsel %vm2425_vm1, %v2444_v60, %v2445_v32  ;;  %v4361_v10 = vld [vmem:[#allocation9 + $0x58] sm:$0xf0]  ;;  %v4926_v11 = vld [vmem:[#allocation9 + $0xd4] sm:$0xf]  ;;  %v4564_v12 = vor.u32 %v4960_v0, %v4561_v1  ;;  %v4908_v16 = vld [vmem:[#allocation9 + $0x44] sm:$0xf] }
 0x1ff   : > { %2901 = vmatpush.bf16.msra.mxu3 %v4520_v29  ;;  %v2448_v5 = vsel %vm2427_vm2, %v2446_v2, %v2447_v3  ;;  %v4425_v13 = vld [vmem:[#allocation9 + $0xd8] sm:$0xf0]  ;;  %v4942_v43 = vld [vmem:[#allocation9 + $0x154] sm:$0xf]  ;;  %v4364_v41 = vor.u32 %v4910_v9, %v4361_v10  ;;  %v4353_v19 = vld [vmem:[#allocation9 + $0x48] sm:$0xf0] }
 0x200   : > { %2863 = vmatpush.bf16.msra.mxu0 %v4320_v38  ;;  %v2450_v8 = vadd.f32 %v2448_v5, %v2436_v33  ;;  %v4489_v14 = vld [vmem:[#allocation9 + $0x158] sm:$0xf0]  ;;  %v4958_v40 = vld [vmem:[#allocation9 + $0x1d4] sm:$0xf]  ;;  %v4428_v17 = vor.u32 %v4926_v11, %v4425_v13  ;;  %v4924_v20 = vld [vmem:[#allocation9 + $0xc4] sm:$0xf]  ;;  %v4356_v29 = vor.u32 %v4908_v16, %v4353_v19 }
 0x201   : > { %2876 = vmatpush.bf16.msra.mxu1 %v4384_v39  ;;  %v4553_v15 = vld [vmem:[#allocation9 + $0x1d8] sm:$0xf0]  ;;  %v4492_v18 = vor.u32 %v4942_v43, %v4489_v14  ;;  %v4417_v22 = vld [vmem:[#allocation9 + $0xc8] sm:$0xf0]  ;;  %v4940_v23 = vld [vmem:[#allocation9 + $0x144] sm:$0xf] }
 0x202   : > { %2889 = vmatpush.bf16.msra.mxu2 %v4448_v42  ;;  %v2451_v37 = vmax.f32 %v2450_v8, 0.0  ;;  %v4556_v21 = vor.u32 %v4958_v40, %v4553_v15  ;;  %v4481_v24 = vld [vmem:[#allocation9 + $0x148] sm:$0xf0]  ;;  %v4956_v25 = vld [vmem:[#allocation9 + $0x1c4] sm:$0xf]  ;;  %v4420_v30 = vor.u32 %v4924_v20, %v4417_v22 }
 0x203   : > { %2902 = vmatpush.bf16.msra.mxu3 %v4512_v53  ;;  %v4545_v28 = vld [vmem:[#allocation9 + $0x1c8] sm:$0xf0]  ;;  %v4484_v31 = vor.u32 %v4940_v23, %v4481_v24  ;;  %v4906_v46 = vld [vmem:[#allocation9 + $0x34] sm:$0xf]  ;;  %v4345_v34 = vld [vmem:[#allocation9 + $0x38] sm:$0xf0] }
 0x204   : > { %2908 = vmatpush.bf16.msrb.mxu0 %v4380_v54  ;;  %2453 = vst [vmem:[#allocation1] ss:$4 sm:$0xff] %v2451_v37  ;;  %v4548_v35 = vor.u32 %v4956_v25, %v4545_v28  ;;  %v4922_v36 = vld [vmem:[#allocation9 + $0xb4] sm:$0xf]  ;;  %v4409_v38 = vld [vmem:[#allocation9 + $0xb8] sm:$0xf0]  ;;  %v4348_v49 = vor.u32 %v4906_v46, %v4345_v34 }
 0x205   : > { %2921 = vmatpush.bf16.msrb.mxu1 %v4444_v55  ;;  %v4938_v39 = vld [vmem:[#allocation9 + $0x134] sm:$0xf]  ;;  %v4473_v42 = vld [vmem:[#allocation9 + $0x138] sm:$0xf0]  ;;  %v4904_v50 = vld [vmem:[#allocation9 + $0x24] sm:$0xf]  ;;  %v4412_v26 = vor.u32 %v4922_v36, %v4409_v38 }
 0x206   : > { %2934 = vmatpush.bf16.msrb.mxu2 %v4508_v58  ;;  %v4954_v44 = vld [vmem:[#allocation9 + $0x1b4] sm:$0xf]  ;;  %v4537_v45 = vld [vmem:[#allocation9 + $0x1b8] sm:$0xf0]  ;;  %v4337_v51 = vld [vmem:[#allocation9 + $0x28] sm:$0xf0]  ;;  %v4476_v58 = vor.u32 %v4938_v39, %v4473_v42 }
 0x207   : > { %2947 = vmatpush.bf16.msrb.mxu3 %v4572_v61  ;;  %v4540_v59 = vor.u32 %v4954_v44, %v4537_v45  ;;  %v4920_v27 = vld [vmem:[#allocation9 + $0xa4] sm:$0xf]  ;;  %v4401_v60 = vld [vmem:[#allocation9 + $0xa8] sm:$0xf0]  ;;  %v4340_v33 = vor.u32 %v4904_v50, %v4337_v51  ;;  %v4902_v1 = vld [vmem:[#allocation9 + $0x14] sm:$0xf] }
 0x208   : > { %2909 = vmatpush.bf16.msrb.mxu0 %v4372_v4  ;;  %v4936_v32 = vld [vmem:[#allocation9 + $0x124] sm:$0xf]  ;;  %v4465_v61 = vld [vmem:[#allocation9 + $0x128] sm:$0xf0]  ;;  %v4404_v0 = vor.u32 %v4920_v27, %v4401_v60  ;;  %v4329_v2 = vld [vmem:[#allocation9 + $0x18] sm:$0xf0] }
 0x209   : > { %2922 = vmatpush.bf16.msrb.mxu1 %v4436_v6  ;;  %v4952_v62 = vld [vmem:[#allocation9 + $0x1a4] sm:$0xf]  ;;  %v4529_v63 = vld [vmem:[#allocation9 + $0x1a8] sm:$0xf0]  ;;  %v4468_v3 = vor.u32 %v4936_v32, %v4465_v61  ;;  %v4918_v5 = vld [vmem:[#allocation9 + $0x94] sm:$0xf]  ;;  %v4332_v11 = vor.u32 %v4902_v1, %v4329_v2 }
 0x20a   : > { %2935 = vmatpush.bf16.msrb.mxu2 %v4500_v7  ;;  %v4532_v4 = vor.u32 %v4952_v62, %v4529_v63  ;;  %v4393_v6 = vld [vmem:[#allocation9 + $0x98] sm:$0xf0]  ;;  %v4934_v7 = vld [vmem:[#allocation9 + $0x114] sm:$0xf]  ;;  %v4900_v13 = vld [vmem:[#allocation9 + $0x4] sm:$0xf] }
 0x20b   : > { %2948 = vmatpush.bf16.msrb.mxu3 %v4564_v12  ;;  %v2456_v47 = vld.sshfl [vmem:[#allocation1 + $0x10] sm:$0xff pattern:$0x73625140]  ;;  %v2454_v48 = vld.sshfl [vmem:[#allocation1] sm:$0xff pattern:$0x73625140]  ;;  %v4396_v12 = vor.u32 %v4918_v5, %v4393_v6 }
 0x20c   : > { %2910 = vmatpush.bf16.msrb.mxu0 %v4364_v41  ;;  %v6190_v52 = vpack.c.bf16 %v2456_v47, %v2456_v47  ;;  %v6192_v53 = vpack.c.bf16 %v2454_v48, %v2454_v48  ;;  %v2457_v54 = vld.sshfl [vmem:[#allocation1 + $0x18] sm:$0xff pattern:$0x73625140]  ;;  %v2455_v55 = vld.sshfl [vmem:[#allocation1 + $0x8] sm:$0xff pattern:$0x73625140] }
 0x20d   : > { %2923 = vmatpush.bf16.msrb.mxu1 %v4428_v17  ;;  %v6194_v56 = vpack.c.bf16 %v2457_v54, %v2457_v54  ;;  %v2463_v57 = vpack.c.bf16 %v2455_v55, %v2455_v55  ;;  %v4457_v8 = vld [vmem:[#allocation9 + $0x118] sm:$0xf0]  ;;  %v4950_v9 = vld [vmem:[#allocation9 + $0x194] sm:$0xf]  ;;  %v4321_v43 = vld [vmem:[#allocation9 + $0x8] sm:$0xf0] }
 0x20e   : > { %2936 = vmatpush.bf16.msrb.mxu2 %v4492_v18  ;;  %2864 = vmatmul.bf16.vlgmr.msra.gmra.mxu0 %v6192_v53  ;;  %v4521_v10 = vld [vmem:[#allocation9 + $0x198] sm:$0xf0]  ;;  %v4460_v14 = vor.u32 %v4934_v7, %v4457_v8  ;;  %v4916_v40 = vld [vmem:[#allocation9 + $0x84] sm:$0xf]  ;;  %v4385_v15 = vld [vmem:[#allocation9 + $0x88] sm:$0xf0]  ;;  %v4324_v19 = vor.u32 %v4900_v13, %v4321_v43 }
 0x20f   : > { %2949 = vmatpush.bf16.msrb.mxu3 %v4556_v21  ;;  %2890 = vmatmul.bf16.vlgmr.msra.gmra.mxu2 %v6190_v52  ;;  %v4524_v37 = vor.u32 %v4950_v9, %v4521_v10  ;;  %v4932_v41 = vld [vmem:[#allocation9 + $0x104] sm:$0xf]  ;;  %v4449_v16 = vld [vmem:[#allocation9 + $0x108] sm:$0xf0]  ;;  %v4388_v20 = vor.u32 %v4916_v40, %v4385_v15  ;;  %v4971_v23 = vld [vmem:[#allocation12 + $0x38] sm:$0xff] }
 0x210   : > { %2911 = vmatpush.bf16.msrb.mxu0 %v4356_v29  ;;  %2903 = vmatmul.bf16.vlgmr.msra.gmra.mxu3 %v6194_v56  ;;  %v4948_v17 = vld [vmem:[#allocation9 + $0x184] sm:$0xf]  ;;  %v4513_v18 = vld [vmem:[#allocation9 + $0x188] sm:$0xf0]  ;;  %v4452_v21 = vor.u32 %v4932_v41, %v4449_v16  ;;  %v4970_v24 = vld [vmem:[#allocation12 + $0x30] sm:$0xff] }
 0x211   : > { %2924 = vmatpush.bf16.msrb.mxu1 %v4420_v30  ;;  %v4516_v22 = vor.u32 %v4948_v17, %v4513_v18  ;;  %v4969_v25 = vld [vmem:[#allocation12 + $0x28] sm:$0xff]  ;;  %v4968_v28 = vld [vmem:[#allocation12 + $0x20] sm:$0xff]  ;;  %v4967_v29 = vld [vmem:[#allocation12 + $0x18] sm:$0xff] }
 0x212   : > { %2937 = vmatpush.bf16.msrb.mxu2 %v4484_v31  ;;  %2877 = vmatmul.bf16.vlgmr.msra.gmra.mxu1 %v2463_v57  ;;  %v4966_v30 = vld [vmem:[#allocation12 + $0x10] sm:$0xff]  ;;  %v4965_v31 = vld [vmem:[#allocation12 + $0x8] sm:$0xff]  ;;  %v4979_v46 = vld [vmem:[#allocation12 + $0x78] sm:$0xff] }
 0x213   : > { %2950 = vmatpush.bf16.msrb.mxu3 %v4548_v35  ;;  %v4964_v34 = vld [vmem:[#allocation12] sm:$0xff]  ;;  %v4978_v35 = vld [vmem:[#allocation12 + $0x70] sm:$0xff]  ;;  %v4977_v36 = vld [vmem:[#allocation12 + $0x68] sm:$0xff] }
 0x214   : > { %2912 = vmatpush.bf16.msrb.mxu0 %v4348_v49  ;;  %v4976_v38 = vld [vmem:[#allocation12 + $0x60] sm:$0xff]  ;;  %v4975_v39 = vld [vmem:[#allocation12 + $0x58] sm:$0xff]  ;;  %v4974_v42 = vld [vmem:[#allocation12 + $0x50] sm:$0xff] }
 0x215   : > { %2925 = vmatpush.bf16.msrb.mxu1 %v4412_v26  ;;  %v2530_v44 = vld [vmem:[#allocation11] sm:$0x3]  ;;  %v4973_v47 = vld [vmem:[#allocation12 + $0x48] sm:$0xff]  ;;  %v4972_v49 = vld [vmem:[#allocation12 + $0x40] sm:$0xff] }
 0x216   : > { %2938 = vmatpush.bf16.msrb.mxu2 %v4476_v58  ;;  %v2532_v45 = vperm.slane %v2530_v44, 0  ;;  %v2533_v60 = vperm.slane %v2530_v44, 1 }
 0x217   : > { %2951 = vmatpush.bf16.msrb.mxu3 %v4540_v59 }
 0x218   : > { %2913 = vmatpush.bf16.msrb.mxu0 %v4340_v33 }
 0x219   : > { %2926 = vmatpush.bf16.msrb.mxu1 %v4404_v0 }
 0x21a   : > { %2939 = vmatpush.bf16.msrb.mxu2 %v4468_v3 }
 0x21b   : > { %2952 = vmatpush.bf16.msrb.mxu3 %v4532_v4 }
 0x21c   : > { %2914 = vmatpush.bf16.msrb.mxu0 %v4332_v11 }
 0x21d   : > { %2927 = vmatpush.bf16.msrb.mxu1 %v4396_v12  ;;  %v5105_v12 = vld [vmem:[#allocation14] ss:$0 sm:$0xff] }
 0x21e   : > { %2940 = vmatpush.bf16.msrb.mxu2 %v4460_v14 }
 0x21f   : > { %2953 = vmatpush.bf16.msrb.mxu3 %v4524_v37 }
 0x220   : > { %2915 = vmatpush.bf16.msrb.mxu0 %v4324_v19 }
 0x221   : > { %2928 = vmatpush.bf16.msrb.mxu1 %v4388_v20 }
 0x222   : > { %2941 = vmatpush.bf16.msrb.mxu2 %v4452_v21 }
 0x223   : > { %2954 = vmatpush.bf16.msrb.mxu3 %v4516_v22  ;;  %2916 = vmatmul.bf16.vlgmr.msrb.gmra.mxu0 %v6192_v53 }
 0x224   : > { %3096 = vmatpush.bf16.msra.mxu0 %v4971_v23  ;;  %2929 = vmatmul.bf16.vlgmr.msrb.gmra.mxu1 %v2463_v57 }
 0x225   : > { %2942 = vmatmul.bf16.vlgmr.msrb.gmra.mxu2 %v6190_v52  ;;  %3109 = vmatpush.bf16.msra.mxu1 %v4979_v46 }
 0x226   : > { %2955 = vmatmul.bf16.vlgmr.msrb.gmra.mxu3 %v6194_v56 }
 0x228   : > { %3097 = vmatpush.bf16.msra.mxu0 %v4970_v24 }
 0x229   : > { %3110 = vmatpush.bf16.msra.mxu1 %v4978_v35 }
 0x22c   : > { %3098 = vmatpush.bf16.msra.mxu0 %v4969_v25 }
 0x22d   : > { %3111 = vmatpush.bf16.msra.mxu1 %v4977_v36 }
 0x230   : > { %3099 = vmatpush.bf16.msra.mxu0 %v4968_v28 }
 0x231   : > { %3112 = vmatpush.bf16.msra.mxu1 %v4976_v38 }
 0x234   : > { %3100 = vmatpush.bf16.msra.mxu0 %v4967_v29 }
 0x235   : > { %3113 = vmatpush.bf16.msra.mxu1 %v4975_v39 }
 0x238   : > { %3101 = vmatpush.bf16.msra.mxu0 %v4966_v30 }
 0x239   : > { %3114 = vmatpush.bf16.msra.mxu1 %v4974_v42 }
 0x23c   : > { %3102 = vmatpush.bf16.msra.mxu0 %v4965_v31 }
 0x23d   : > { %3115 = vmatpush.bf16.msra.mxu1 %v4973_v47 }
 0x240   : > { %3103 = vmatpush.bf16.msra.mxu0 %v4964_v34 }
 0x241   : > { %3116 = vmatpush.bf16.msra.mxu1 %v4972_v49 }
 0x28b   : > { %v2865_v48 = vpop.f32.mrf.mxu0 }
 0x28c   : > { %v2866_v50 = vadd.f32 %v2865_v48, %v2532_v45 }
 0x28f   : > { %v2878_v51 = vpop.f32.mrf.mxu1 }
 0x290   : > { %v2879_v52 = vadd.f32 %v2878_v51, %v2866_v50 }
 0x292   : > { %v2891_v53 = vpop.f32.mrf.mxu2 }
 0x293   : > { %v2892_v54 = vadd.f32 %v2891_v53, %v2879_v52  ;;  %v2904_v55 = vpop.f32.mrf.mxu3  ;;  %v2867_v26 = vpop.f32.mrf.mxu0 }
 0x295   : > { %v2905_v56 = vadd.f32 %v2904_v55, %v2892_v54 }
 0x297   : > { %v2880_v57 = vpop.f32.mrf.mxu1  ;;  %v2960_v58 = vmax.f32 %v2905_v56, 0.0 }
 0x299   : > { %v2962_v59 = vpack.c.bf16 %v2960_v58, %v2960_v58 }
 0x29a   : > { %v2893_v27 = vpop.f32.mrf.mxu2 }
 0x29b   : > { %3104 = vmatmul.bf16.vlgmr.msra.gmra.mxu0 %v2962_v59  ;;  %v2906_v32 = vpop.f32.mrf.mxu3 }
 0x2a0   : > { %v2917_v61 = vpop.f32.mrf.mxu0 }
 0x2a1   : > { %v2930_v62 = vpop.f32.mrf.mxu1  ;;  %v2918_v63 = vadd.f32 %v2917_v61, %v2533_v60 }
 0x2a3   : > { %v2931_v33 = vadd.f32 %v2930_v62, %v2918_v63 }
 0x2a8   : > { %v2943_v0 = vpop.f32.mrf.mxu2  ;;  %v2919_v3 = vpop.f32.mrf.mxu0 }
 0x2a9   : > { %v2956_v1 = vpop.f32.mrf.mxu3  ;;  %v2944_v2 = vadd.f32 %v2943_v0, %v2931_v33  ;;  %v2932_v4 = vpop.f32.mrf.mxu1 }
 0x2ab   : > { %v2957_v5 = vadd.f32 %v2956_v1, %v2944_v2 }
 0x2ad   : > { %v2961_v6 = vmax.f32 %v2957_v5, 0.0 }
 0x2af   : > { %v2963_v7 = vpack.c.bf16 %v2961_v6, %v2961_v6 }
 0x2b0   : > { %v2945_v8 = vpop.f32.mrf.mxu2 }
 0x2b1   : > { %v2958_v9 = vpop.f32.mrf.mxu3  ;;  %3117 = vmatmul.bf16.vlgmr.msra.gmra.mxu1 %v2963_v7 }
 0x318   : > { %v3105_v10 = vpop.f32.mrf.mxu0 }
 0x319   : > { %v3106_v13 = vadd.f32 %v5105_v12, %v3105_v10 }
 0x320   : > { %v3107_v11 = vpop.f32.mrf.mxu0 }
 0x32e   : > { %v3118_v43 = vpop.f32.mrf.mxu1 }
 0x32f   : > { %v3119_v14 = vadd.f32 %v3118_v43, %v3106_v13 }
 0x331   : > { %3122 = vst [vmem:[#allocation15] sm:$0x3] %v3119_v14 }
 0x336   : > { %v3120_v37 = vpop.f32.mrf.mxu1 }
 0x337 PF: > { %p5042_p3 = scmp.eq.s32.totalorder %s5500_s30, 3  ;;  %s3133_s17 = sshll.u32 %s6231_s7, 4  ;;  %s3134_s17 = int_to_ptr.hbm [resolvable:$true] %s3133_s17 }
 0x338   : > { %s5428_s12 = smov [#allocation15]  }
 0x339   : > { %s3131_s15 = sshll.u32 %s5428_s12, 4  ;;  %s3132_s15 = int_to_ptr.vmem [resolvable:$true] %s3131_s15 }
 0x33a   : > { %5005 = dma.vmem_to_hbm [thread:$0]  (%p5042_p3), %s3132_s15, 32, %s3134_s17, [#allocation5]  }
 0x33b   : > { %5389 = dma.done.wait (%p5042_p3), [#allocation5], 32  }
 0x33c   : > { %5391 = vsyncadd (%p5042_p3), [#allocation5], 4294967264 }
 0x33d PF: > { %s26_s29 = sadd.s32 1, %s5414_s29   ;;  %s6245_s24 = smov %s5398_s25 }
 0x33e   : > { %p23_p4 = scmp.ge.s32.totalorder %s26_s29, 6   ;;  %s6246_s25 = smov %s5402_s26 }
 0x33f   : > { %s6247_s26 = smov %s5567_s18  ;;  %s6248_s27 = smov %s5410_s28 }
 0x340   : > { %s6249_s28 = smov %s6251_s9  ;;  %25 = sbr.rel (!%p23_p4) target bundleno = 14 (0xe), region = 128 }
 0x345   :  { %3147 = vsyncpa [#allocation4], 1 }
 0x346   :  { %3149 = vsyncpa [#allocation4 + $0x1], 1 }
 0x347   :  { %3150 = vsyncpa [#allocation7], 1 }
 0x348   :  { %3152 = vsyncpa [#allocation7 + $0x1], 1 }
 0x349   :  { %3153 = vsyncpa [#allocation10], 1 }
 0x34a   :  { %3154 = vsyncpa [#allocation13], 1 }
 0x34b   :  { %3155 = vsyncpa [#allocation5], 1 }
 0x34c   :  { %3157 = vsyncpa [#allocation5 + $0x1], 1 }

</bundles_post_ra>
